<compile_context>
chip_gen: v6e
topology: v6e:2x2x1
jax: 0.10.0
libtpu: 0.0.40
codegen_flags: <defaults>
</compile_context>

<pallas_src>
import jax
import jax.numpy as jnp
from jax.experimental import pallas as pl
from jax.experimental.pallas import tpu as pltpu


def make_morlet_weights(a, b, channel_in, kernel_size, sample_rate):
    """Build the Morlet wavelet conv weights exactly as the PyTorch module does (glue)."""
    # The module's reshape to (Cout, Cin, kH, kW) is only shape-consistent for Cin == 1.
    assert channel_in == 1, "MorletConv2d weight reshape requires channel_in == 1"
    kH, kW = kernel_size
    K = kH * kW
    channel_out = a.shape[0]
    window_len_time = K / sample_rate
    t = jnp.linspace(0.0, window_len_time, K, dtype=jnp.float32) - window_len_time / 2.0
    t_row = t.reshape(1, K)
    kern = jnp.exp(-0.5 * jnp.square(a @ t_row)) * jnp.cos(b @ (2.0 * 3.1415926 * t_row))
    return kern.reshape(channel_out, channel_in, kH, kW)


def _round_up(x, m):
    return ((x + m - 1) // m) * m


def morlet_conv2d(x, a, b, kernel_size, stride=1, padding=0, sample_rate=250,
                  vmem_working_set_bytes=32 * 1024 * 1024,
                  vmem_limit_bytes=48 * 1024 * 1024,
                  min_grid_steps=4):
    """Forward of MorletConv2d: Morlet conv2d (strided, zero-padded) + log_softmax(dim=-1)."""
    if x.ndim == 3:                          # mirror torch.unsqueeze(x, dim=1)
        x = x[:, None, :, :]
    if isinstance(stride, int):
        stride = (stride, stride)
    if isinstance(padding, int):
        padding = (padding, padding)

    kH, kW = kernel_size
    sh, sw = stride
    ph, pw = padding
    Cout = a.shape[0]
    N, Cin, H0, W0 = x.shape

    w4 = make_morlet_weights(a, b, Cin, kernel_size, sample_rate)
    K = Cin * kH * kW
    w_flat = w4.reshape(Cout, K).astype(jnp.float32)      # (Cout, K) scalars -> SMEM

    # Conv geometry on the conv-padded input.
    H = H0 + 2 * ph
    W = W0 + 2 * pw
    Ho = (H - kH) // sh + 1
    Wo = (W - kW) // sw + 1
    assert Ho >= 1 and Wo >= 1, "kernel larger than (padded) input"

    # Lane-dense width: pad W so the kernel can slice/accumulate/store full
    # 128-lane rows of width Wo_pad (review: pad up front, no in-kernel concat).
    Wo_pad = _round_up(Wo, 128)
    W_need = (Wo_pad - 1) * sw + kW
    W_total = max(W, W_need)

    # ---- batch-block sizing with corrected VMEM accounting ------------------
    f32 = 4
    in_block_1 = Cin * H * W_total * f32                   # input block, per image
    out_block_1 = Cout * Ho * Wo_pad * f32                 # output block, per image
    # in-kernel temporaries per image: live tap slab + Cout accumulators +
    # ~3 softmax temporaries + the materialized x-block value read.
    tmp_1 = (Cout + 4) * Ho * Wo_pad * f32 + in_block_1
    per_image = 2 * in_block_1 + 2 * out_block_1 + tmp_1   # x2 = BlockSpec double buffers
    nb_budget = max(1, int(vmem_working_set_bytes // per_image))
    nb_steps = max(1, -(-N // min_grid_steps))             # keep >= min_grid_steps steps
    Nb = max(1, min(nb_budget, nb_steps, N))
    N_pad = _round_up(N, Nb)                               # pad the batch; no divisor cliff

    x = x.astype(jnp.float32)
    x = jnp.pad(x, ((0, N_pad - N), (0, 0),
                    (ph, ph), (pw, pw + (W_total - W))))   # one fused pad pass
    # x: (N_pad, Cin, H, W_total)

    grid = (N_pad // Nb,)

    def kernel(x_ref, w_ref, o_ref):
        # x_ref: (Nb, Cin, H, W_total) VMEM
        # w_ref: (Cout, K)            SMEM (scalar weights)
        # o_ref: (Nb, Cout, Ho, Wo_pad) VMEM -- final NCHW layout, lane-padded
        xb = x_ref[...]

        # Weight-stationary broadcast-FMA over the K taps: each tap is sliced
        # ONCE and reused for all Cout channels.  No reshapes: row dims stay on
        # sublanes, Wo_pad stays on lanes, so no relayout copies.
        accs = [None] * Cout
        k = 0
        for ci in range(Cin):
            xc = xb[:, ci]                                  # (Nb, H, W_total)
            for ih in range(kH):
                for iw in range(kW):
                    # TODO(synk): for sw > 1 a reshape-based phase select would
                    # avoid the lane-strided slice; stride == 1 in this model.
                    tap = xc[:, ih:ih + (Ho - 1) * sh + 1:sh,
                                iw:iw + (Wo_pad - 1) * sw + 1:sw]   # (Nb, Ho, Wo_pad)
                    for o in range(Cout):
                        wk = w_ref[o, k]                    # SMEM scalar -> VPU splat
                        accs[o] = wk * tap if accs[o] is None else accs[o] + wk * tap
                    k += 1

        # Fused F.log_softmax(out, dim=-1): pad lanes are masked to -inf before
        # the reductions (input pad is zeros, so acc there is finite); the pad
        # lanes' garbage outputs are sliced off in the wrapper.
        lane = jax.lax.broadcasted_iota(jnp.int32, (Nb, Ho, Wo_pad), 2)
        valid = lane < Wo
        for o in range(Cout):
            acc = accs[o]                                   # (Nb, Ho, Wo_pad) f32
            zm = jnp.where(valid, acc, -jnp.inf)
            m = jnp.max(zm, axis=-1, keepdims=True)
            e = jnp.exp(zm - m)                             # pad lanes -> exp(-inf) = 0
            s = jnp.sum(e, axis=-1, keepdims=True)
            ls = acc - m - jnp.log(s)
            o_ref[:, o, :, :] = ls.astype(o_ref.dtype)

    out_padded = pl.pallas_call(
        kernel,
        out_shape=jax.ShapeDtypeStruct((N_pad, Cout, Ho, Wo_pad), jnp.float32),
        grid=grid,
        in_specs=[
            pl.BlockSpec((Nb, Cin, H, W_total), lambda g: (g, 0, 0, 0)),
            pl.BlockSpec(memory_space=pltpu.MemorySpace.SMEM),
        ],
        out_specs=pl.BlockSpec((Nb, Cout, Ho, Wo_pad), lambda g: (g, 0, 0, 0)),
        compiler_params=pltpu.CompilerParams(
            dimension_semantics=("parallel",),
            vmem_limit_bytes=vmem_limit_bytes),
    )(x, w_flat)

    # Wrapper-side: only slice off the batch / lane padding (no transpose).
    return out_padded[:N, :, :, :Wo]


if __name__ == "__main__":
    key = jax.random.PRNGKey(0)
    ka, kb, kx = jax.random.split(key, 3)

    # Small shapes consistent with the module (its weight reshape forces Cin == 1).
    channel_in, channel_out = 1, 4
    kernel_size = (1, 16)
    N, H, W = 2, 8, 64
    sample_rate = 250

    # Deterministic init mirroring nn.Parameter(torch.rand(...) * (hi - lo) + lo)
    a = jax.random.uniform(ka, (channel_out, 1), jnp.float32) * (10.0 - 1.0) + 1.0
    b = jax.random.uniform(kb, (channel_out, 1), jnp.float32) * (40.0 - 3.0) + 3.0
    x = jax.random.normal(kx, (N, channel_in, H, W), jnp.float32)

    out = morlet_conv2d(x, a, b, kernel_size, stride=1, padding=0,
                        sample_rate=sample_rate)
    out = jax.block_until_ready(out)

    # Pure-JAX reference (conv2d VALID + log_softmax over the last axis).
    w4 = make_morlet_weights(a, b, channel_in, kernel_size, sample_rate)
    ref = jax.lax.conv_general_dilated(
        x, w4, window_strides=(1, 1), padding="VALID",
        dimension_numbers=("NCHW", "OIHW", "NCHW"),
        precision=jax.lax.Precision.HIGHEST)
    ref = jax.nn.log_softmax(ref, axis=-1)

    assert out.shape == ref.shape == (N, channel_out,
                                      H - kernel_size[0] + 1, W - kernel_size[1] + 1)
    assert jnp.allclose(out, ref, atol=1e-3, rtol=1e-3), "mismatch vs JAX reference"
    print("KERNEL_OK")
</pallas_src>

<mosaic_0001>
module attributes {stable_mosaic.version = 11 : i64} {
  func.func @kernel(%arg0: i32, %arg1: memref<1x1x8x143xf32, #tpu.memory_space<vmem>>, %arg2: memref<4x16xf32, #tpu.memory_space<smem>>, %arg3: memref<1x4x8x128xf32, #tpu.memory_space<vmem>>) attributes {dimension_semantics = [#tpu.dimension_semantics<parallel>], iteration_bounds = array<i64: 2>, scalar_prefetch = 0 : i64, scratch_operands = 0 : i64, tpu.core_type = #tpu.core_type<tc>, window_params = [{transform_indices = @transform_0, window_bounds = array<i64: 1, 1, 8, 143>}, {transform_indices = @transform_1, window_bounds = array<i64: 4, 16>}, {transform_indices = @transform_2, window_bounds = array<i64: 1, 4, 8, 128>}]} {
    %c0 = arith.constant 0 : index
    %c0_0 = arith.constant 0 : index
    %c0_1 = arith.constant 0 : index
    %c0_2 = arith.constant 0 : index
    %0 = vector.load %arg1[%c0, %c0_0, %c0_1, %c0_2] : memref<1x1x8x143xf32, #tpu.memory_space<vmem>>, vector<1x1x8x143xf32>
    %1 = vector.shape_cast %0 : vector<1x1x8x143xf32> to vector<1x8x143xf32>
    %2 = vector.extract_strided_slice %1 {offsets = [0, 0, 0], sizes = [1, 8, 128], strides = [1, 1, 1]} : vector<1x8x143xf32> to vector<1x8x128xf32>
    %c0_3 = arith.constant 0 : index
    %c0_4 = arith.constant 0 : index
    %3 = memref.load %arg2[%c0_3, %c0_4] : memref<4x16xf32, #tpu.memory_space<smem>>
    %4 = vector.broadcast %3 : f32 to vector<1x8x128xf32>
    %5 = arith.mulf %4, %2 : vector<1x8x128xf32>
    %c1 = arith.constant 1 : index
    %c0_5 = arith.constant 0 : index
    %6 = memref.load %arg2[%c1, %c0_5] : memref<4x16xf32, #tpu.memory_space<smem>>
    %7 = vector.broadcast %6 : f32 to vector<1x8x128xf32>
    %8 = arith.mulf %7, %2 : vector<1x8x128xf32>
    %c2 = arith.constant 2 : index
    %c0_6 = arith.constant 0 : index
    %9 = memref.load %arg2[%c2, %c0_6] : memref<4x16xf32, #tpu.memory_space<smem>>
    %10 = vector.broadcast %9 : f32 to vector<1x8x128xf32>
    %11 = arith.mulf %10, %2 : vector<1x8x128xf32>
    %c3 = arith.constant 3 : index
    %c0_7 = arith.constant 0 : index
    %12 = memref.load %arg2[%c3, %c0_7] : memref<4x16xf32, #tpu.memory_space<smem>>
    %13 = vector.broadcast %12 : f32 to vector<1x8x128xf32>
    %14 = arith.mulf %13, %2 : vector<1x8x128xf32>
    %15 = vector.extract_strided_slice %1 {offsets = [0, 0, 1], sizes = [1, 8, 128], strides = [1, 1, 1]} : vector<1x8x143xf32> to vector<1x8x128xf32>
    %c0_8 = arith.constant 0 : index
    %c1_9 = arith.constant 1 : index
    %16 = memref.load %arg2[%c0_8, %c1_9] : memref<4x16xf32, #tpu.memory_space<smem>>
    %17 = vector.broadcast %16 : f32 to vector<1x8x128xf32>
    %18 = arith.mulf %17, %15 : vector<1x8x128xf32>
    %19 = arith.addf %5, %18 : vector<1x8x128xf32>
    %c1_10 = arith.constant 1 : index
    %c1_11 = arith.constant 1 : index
    %20 = memref.load %arg2[%c1_10, %c1_11] : memref<4x16xf32, #tpu.memory_space<smem>>
    %21 = vector.broadcast %20 : f32 to vector<1x8x128xf32>
    %22 = arith.mulf %21, %15 : vector<1x8x128xf32>
    %23 = arith.addf %8, %22 : vector<1x8x128xf32>
    %c2_12 = arith.constant 2 : index
    %c1_13 = arith.constant 1 : index
    %24 = memref.load %arg2[%c2_12, %c1_13] : memref<4x16xf32, #tpu.memory_space<smem>>
    %25 = vector.broadcast %24 : f32 to vector<1x8x128xf32>
    %26 = arith.mulf %25, %15 : vector<1x8x128xf32>
    %27 = arith.addf %11, %26 : vector<1x8x128xf32>
    %c3_14 = arith.constant 3 : index
    %c1_15 = arith.constant 1 : index
    %28 = memref.load %arg2[%c3_14, %c1_15] : memref<4x16xf32, #tpu.memory_space<smem>>
    %29 = vector.broadcast %28 : f32 to vector<1x8x128xf32>
    %30 = arith.mulf %29, %15 : vector<1x8x128xf32>
    %31 = arith.addf %14, %30 : vector<1x8x128xf32>
    %32 = vector.extract_strided_slice %1 {offsets = [0, 0, 2], sizes = [1, 8, 128], strides = [1, 1, 1]} : vector<1x8x143xf32> to vector<1x8x128xf32>
    %c0_16 = arith.constant 0 : index
    %c2_17 = arith.constant 2 : index
    %33 = memref.load %arg2[%c0_16, %c2_17] : memref<4x16xf32, #tpu.memory_space<smem>>
    %34 = vector.broadcast %33 : f32 to vector<1x8x128xf32>
    %35 = arith.mulf %34, %32 : vector<1x8x128xf32>
    %36 = arith.addf %19, %35 : vector<1x8x128xf32>
    %c1_18 = arith.constant 1 : index
    %c2_19 = arith.constant 2 : index
    %37 = memref.load %arg2[%c1_18, %c2_19] : memref<4x16xf32, #tpu.memory_space<smem>>
    %38 = vector.broadcast %37 : f32 to vector<1x8x128xf32>
    %39 = arith.mulf %38, %32 : vector<1x8x128xf32>
    %40 = arith.addf %23, %39 : vector<1x8x128xf32>
    %c2_20 = arith.constant 2 : index
    %c2_21 = arith.constant 2 : index
    %41 = memref.load %arg2[%c2_20, %c2_21] : memref<4x16xf32, #tpu.memory_space<smem>>
    %42 = vector.broadcast %41 : f32 to vector<1x8x128xf32>
    %43 = arith.mulf %42, %32 : vector<1x8x128xf32>
    %44 = arith.addf %27, %43 : vector<1x8x128xf32>
    %c3_22 = arith.constant 3 : index
    %c2_23 = arith.constant 2 : index
    %45 = memref.load %arg2[%c3_22, %c2_23] : memref<4x16xf32, #tpu.memory_space<smem>>
    %46 = vector.broadcast %45 : f32 to vector<1x8x128xf32>
    %47 = arith.mulf %46, %32 : vector<1x8x128xf32>
    %48 = arith.addf %31, %47 : vector<1x8x128xf32>
    %49 = vector.extract_strided_slice %1 {offsets = [0, 0, 3], sizes = [1, 8, 128], strides = [1, 1, 1]} : vector<1x8x143xf32> to vector<1x8x128xf32>
    %c0_24 = arith.constant 0 : index
    %c3_25 = arith.constant 3 : index
    %50 = memref.load %arg2[%c0_24, %c3_25] : memref<4x16xf32, #tpu.memory_space<smem>>
    %51 = vector.broadcast %50 : f32 to vector<1x8x128xf32>
    %52 = arith.mulf %51, %49 : vector<1x8x128xf32>
    %53 = arith.addf %36, %52 : vector<1x8x128xf32>
    %c1_26 = arith.constant 1 : index
    %c3_27 = arith.constant 3 : index
    %54 = memref.load %arg2[%c1_26, %c3_27] : memref<4x16xf32, #tpu.memory_space<smem>>
    %55 = vector.broadcast %54 : f32 to vector<1x8x128xf32>
    %56 = arith.mulf %55, %49 : vector<1x8x128xf32>
    %57 = arith.addf %40, %56 : vector<1x8x128xf32>
    %c2_28 = arith.constant 2 : index
    %c3_29 = arith.constant 3 : index
    %58 = memref.load %arg2[%c2_28, %c3_29] : memref<4x16xf32, #tpu.memory_space<smem>>
    %59 = vector.broadcast %58 : f32 to vector<1x8x128xf32>
    %60 = arith.mulf %59, %49 : vector<1x8x128xf32>
    %61 = arith.addf %44, %60 : vector<1x8x128xf32>
    %c3_30 = arith.constant 3 : index
    %c3_31 = arith.constant 3 : index
    %62 = memref.load %arg2[%c3_30, %c3_31] : memref<4x16xf32, #tpu.memory_space<smem>>
    %63 = vector.broadcast %62 : f32 to vector<1x8x128xf32>
    %64 = arith.mulf %63, %49 : vector<1x8x128xf32>
    %65 = arith.addf %48, %64 : vector<1x8x128xf32>
    %66 = vector.extract_strided_slice %1 {offsets = [0, 0, 4], sizes = [1, 8, 128], strides = [1, 1, 1]} : vector<1x8x143xf32> to vector<1x8x128xf32>
    %c0_32 = arith.constant 0 : index
    %c4 = arith.constant 4 : index
    %67 = memref.load %arg2[%c0_32, %c4] : memref<4x16xf32, #tpu.memory_space<smem>>
    %68 = vector.broadcast %67 : f32 to vector<1x8x128xf32>
    %69 = arith.mulf %68, %66 : vector<1x8x128xf32>
    %70 = arith.addf %53, %69 : vector<1x8x128xf32>
    %c1_33 = arith.constant 1 : index
    %c4_34 = arith.constant 4 : index
    %71 = memref.load %arg2[%c1_33, %c4_34] : memref<4x16xf32, #tpu.memory_space<smem>>
    %72 = vector.broadcast %71 : f32 to vector<1x8x128xf32>
    %73 = arith.mulf %72, %66 : vector<1x8x128xf32>
    %74 = arith.addf %57, %73 : vector<1x8x128xf32>
    %c2_35 = arith.constant 2 : index
    %c4_36 = arith.constant 4 : index
    %75 = memref.load %arg2[%c2_35, %c4_36] : memref<4x16xf32, #tpu.memory_space<smem>>
    %76 = vector.broadcast %75 : f32 to vector<1x8x128xf32>
    %77 = arith.mulf %76, %66 : vector<1x8x128xf32>
    %78 = arith.addf %61, %77 : vector<1x8x128xf32>
    %c3_37 = arith.constant 3 : index
    %c4_38 = arith.constant 4 : index
    %79 = memref.load %arg2[%c3_37, %c4_38] : memref<4x16xf32, #tpu.memory_space<smem>>
    %80 = vector.broadcast %79 : f32 to vector<1x8x128xf32>
    %81 = arith.mulf %80, %66 : vector<1x8x128xf32>
    %82 = arith.addf %65, %81 : vector<1x8x128xf32>
    %83 = vector.extract_strided_slice %1 {offsets = [0, 0, 5], sizes = [1, 8, 128], strides = [1, 1, 1]} : vector<1x8x143xf32> to vector<1x8x128xf32>
    %c0_39 = arith.constant 0 : index
    %c5 = arith.constant 5 : index
    %84 = memref.load %arg2[%c0_39, %c5] : memref<4x16xf32, #tpu.memory_space<smem>>
    %85 = vector.broadcast %84 : f32 to vector<1x8x128xf32>
    %86 = arith.mulf %85, %83 : vector<1x8x128xf32>
    %87 = arith.addf %70, %86 : vector<1x8x128xf32>
    %c1_40 = arith.constant 1 : index
    %c5_41 = arith.constant 5 : index
    %88 = memref.load %arg2[%c1_40, %c5_41] : memref<4x16xf32, #tpu.memory_space<smem>>
    %89 = vector.broadcast %88 : f32 to vector<1x8x128xf32>
    %90 = arith.mulf %89, %83 : vector<1x8x128xf32>
    %91 = arith.addf %74, %90 : vector<1x8x128xf32>
    %c2_42 = arith.constant 2 : index
    %c5_43 = arith.constant 5 : index
    %92 = memref.load %arg2[%c2_42, %c5_43] : memref<4x16xf32, #tpu.memory_space<smem>>
    %93 = vector.broadcast %92 : f32 to vector<1x8x128xf32>
    %94 = arith.mulf %93, %83 : vector<1x8x128xf32>
    %95 = arith.addf %78, %94 : vector<1x8x128xf32>
    %c3_44 = arith.constant 3 : index
    %c5_45 = arith.constant 5 : index
    %96 = memref.load %arg2[%c3_44, %c5_45] : memref<4x16xf32, #tpu.memory_space<smem>>
    %97 = vector.broadcast %96 : f32 to vector<1x8x128xf32>
    %98 = arith.mulf %97, %83 : vector<1x8x128xf32>
    %99 = arith.addf %82, %98 : vector<1x8x128xf32>
    %100 = vector.extract_strided_slice %1 {offsets = [0, 0, 6], sizes = [1, 8, 128], strides = [1, 1, 1]} : vector<1x8x143xf32> to vector<1x8x128xf32>
    %c0_46 = arith.constant 0 : index
    %c6 = arith.constant 6 : index
    %101 = memref.load %arg2[%c0_46, %c6] : memref<4x16xf32, #tpu.memory_space<smem>>
    %102 = vector.broadcast %101 : f32 to vector<1x8x128xf32>
    %103 = arith.mulf %102, %100 : vector<1x8x128xf32>
    %104 = arith.addf %87, %103 : vector<1x8x128xf32>
    %c1_47 = arith.constant 1 : index
    %c6_48 = arith.constant 6 : index
    %105 = memref.load %arg2[%c1_47, %c6_48] : memref<4x16xf32, #tpu.memory_space<smem>>
    %106 = vector.broadcast %105 : f32 to vector<1x8x128xf32>
    %107 = arith.mulf %106, %100 : vector<1x8x128xf32>
    %108 = arith.addf %91, %107 : vector<1x8x128xf32>
    %c2_49 = arith.constant 2 : index
    %c6_50 = arith.constant 6 : index
    %109 = memref.load %arg2[%c2_49, %c6_50] : memref<4x16xf32, #tpu.memory_space<smem>>
    %110 = vector.broadcast %109 : f32 to vector<1x8x128xf32>
    %111 = arith.mulf %110, %100 : vector<1x8x128xf32>
    %112 = arith.addf %95, %111 : vector<1x8x128xf32>
    %c3_51 = arith.constant 3 : index
    %c6_52 = arith.constant 6 : index
    %113 = memref.load %arg2[%c3_51, %c6_52] : memref<4x16xf32, #tpu.memory_space<smem>>
    %114 = vector.broadcast %113 : f32 to vector<1x8x128xf32>
    %115 = arith.mulf %114, %100 : vector<1x8x128xf32>
    %116 = arith.addf %99, %115 : vector<1x8x128xf32>
    %117 = vector.extract_strided_slice %1 {offsets = [0, 0, 7], sizes = [1, 8, 128], strides = [1, 1, 1]} : vector<1x8x143xf32> to vector<1x8x128xf32>
    %c0_53 = arith.constant 0 : index
    %c7 = arith.constant 7 : index
    %118 = memref.load %arg2[%c0_53, %c7] : memref<4x16xf32, #tpu.memory_space<smem>>
    %119 = vector.broadcast %118 : f32 to vector<1x8x128xf32>
    %120 = arith.mulf %119, %117 : vector<1x8x128xf32>
    %121 = arith.addf %104, %120 : vector<1x8x128xf32>
    %c1_54 = arith.constant 1 : index
    %c7_55 = arith.constant 7 : index
    %122 = memref.load %arg2[%c1_54, %c7_55] : memref<4x16xf32, #tpu.memory_space<smem>>
    %123 = vector.broadcast %122 : f32 to vector<1x8x128xf32>
    %124 = arith.mulf %123, %117 : vector<1x8x128xf32>
    %125 = arith.addf %108, %124 : vector<1x8x128xf32>
    %c2_56 = arith.constant 2 : index
    %c7_57 = arith.constant 7 : index
    %126 = memref.load %arg2[%c2_56, %c7_57] : memref<4x16xf32, #tpu.memory_space<smem>>
    %127 = vector.broadcast %126 : f32 to vector<1x8x128xf32>
    %128 = arith.mulf %127, %117 : vector<1x8x128xf32>
    %129 = arith.addf %112, %128 : vector<1x8x128xf32>
    %c3_58 = arith.constant 3 : index
    %c7_59 = arith.constant 7 : index
    %130 = memref.load %arg2[%c3_58, %c7_59] : memref<4x16xf32, #tpu.memory_space<smem>>
    %131 = vector.broadcast %130 : f32 to vector<1x8x128xf32>
    %132 = arith.mulf %131, %117 : vector<1x8x128xf32>
    %133 = arith.addf %116, %132 : vector<1x8x128xf32>
    %134 = vector.extract_strided_slice %1 {offsets = [0, 0, 8], sizes = [1, 8, 128], strides = [1, 1, 1]} : vector<1x8x143xf32> to vector<1x8x128xf32>
    %c0_60 = arith.constant 0 : index
    %c8 = arith.constant 8 : index
    %135 = memref.load %arg2[%c0_60, %c8] : memref<4x16xf32, #tpu.memory_space<smem>>
    %136 = vector.broadcast %135 : f32 to vector<1x8x128xf32>
    %137 = arith.mulf %136, %134 : vector<1x8x128xf32>
    %138 = arith.addf %121, %137 : vector<1x8x128xf32>
    %c1_61 = arith.constant 1 : index
    %c8_62 = arith.constant 8 : index
    %139 = memref.load %arg2[%c1_61, %c8_62] : memref<4x16xf32, #tpu.memory_space<smem>>
    %140 = vector.broadcast %139 : f32 to vector<1x8x128xf32>
    %141 = arith.mulf %140, %134 : vector<1x8x128xf32>
    %142 = arith.addf %125, %141 : vector<1x8x128xf32>
    %c2_63 = arith.constant 2 : index
    %c8_64 = arith.constant 8 : index
    %143 = memref.load %arg2[%c2_63, %c8_64] : memref<4x16xf32, #tpu.memory_space<smem>>
    %144 = vector.broadcast %143 : f32 to vector<1x8x128xf32>
    %145 = arith.mulf %144, %134 : vector<1x8x128xf32>
    %146 = arith.addf %129, %145 : vector<1x8x128xf32>
    %c3_65 = arith.constant 3 : index
    %c8_66 = arith.constant 8 : index
    %147 = memref.load %arg2[%c3_65, %c8_66] : memref<4x16xf32, #tpu.memory_space<smem>>
    %148 = vector.broadcast %147 : f32 to vector<1x8x128xf32>
    %149 = arith.mulf %148, %134 : vector<1x8x128xf32>
    %150 = arith.addf %133, %149 : vector<1x8x128xf32>
    %151 = vector.extract_strided_slice %1 {offsets = [0, 0, 9], sizes = [1, 8, 128], strides = [1, 1, 1]} : vector<1x8x143xf32> to vector<1x8x128xf32>
    %c0_67 = arith.constant 0 : index
    %c9 = arith.constant 9 : index
    %152 = memref.load %arg2[%c0_67, %c9] : memref<4x16xf32, #tpu.memory_space<smem>>
    %153 = vector.broadcast %152 : f32 to vector<1x8x128xf32>
    %154 = arith.mulf %153, %151 : vector<1x8x128xf32>
    %155 = arith.addf %138, %154 : vector<1x8x128xf32>
    %c1_68 = arith.constant 1 : index
    %c9_69 = arith.constant 9 : index
    %156 = memref.load %arg2[%c1_68, %c9_69] : memref<4x16xf32, #tpu.memory_space<smem>>
    %157 = vector.broadcast %156 : f32 to vector<1x8x128xf32>
    %158 = arith.mulf %157, %151 : vector<1x8x128xf32>
    %159 = arith.addf %142, %158 : vector<1x8x128xf32>
    %c2_70 = arith.constant 2 : index
    %c9_71 = arith.constant 9 : index
    %160 = memref.load %arg2[%c2_70, %c9_71] : memref<4x16xf32, #tpu.memory_space<smem>>
    %161 = vector.broadcast %160 : f32 to vector<1x8x128xf32>
    %162 = arith.mulf %161, %151 : vector<1x8x128xf32>
    %163 = arith.addf %146, %162 : vector<1x8x128xf32>
    %c3_72 = arith.constant 3 : index
    %c9_73 = arith.constant 9 : index
    %164 = memref.load %arg2[%c3_72, %c9_73] : memref<4x16xf32, #tpu.memory_space<smem>>
    %165 = vector.broadcast %164 : f32 to vector<1x8x128xf32>
    %166 = arith.mulf %165, %151 : vector<1x8x128xf32>
    %167 = arith.addf %150, %166 : vector<1x8x128xf32>
    %168 = vector.extract_strided_slice %1 {offsets = [0, 0, 10], sizes = [1, 8, 128], strides = [1, 1, 1]} : vector<1x8x143xf32> to vector<1x8x128xf32>
    %c0_74 = arith.constant 0 : index
    %c10 = arith.constant 10 : index
    %169 = memref.load %arg2[%c0_74, %c10] : memref<4x16xf32, #tpu.memory_space<smem>>
    %170 = vector.broadcast %169 : f32 to vector<1x8x128xf32>
    %171 = arith.mulf %170, %168 : vector<1x8x128xf32>
    %172 = arith.addf %155, %171 : vector<1x8x128xf32>
    %c1_75 = arith.constant 1 : index
    %c10_76 = arith.constant 10 : index
    %173 = memref.load %arg2[%c1_75, %c10_76] : memref<4x16xf32, #tpu.memory_space<smem>>
    %174 = vector.broadcast %173 : f32 to vector<1x8x128xf32>
    %175 = arith.mulf %174, %168 : vector<1x8x128xf32>
    %176 = arith.addf %159, %175 : vector<1x8x128xf32>
    %c2_77 = arith.constant 2 : index
    %c10_78 = arith.constant 10 : index
    %177 = memref.load %arg2[%c2_77, %c10_78] : memref<4x16xf32, #tpu.memory_space<smem>>
    %178 = vector.broadcast %177 : f32 to vector<1x8x128xf32>
    %179 = arith.mulf %178, %168 : vector<1x8x128xf32>
    %180 = arith.addf %163, %179 : vector<1x8x128xf32>
    %c3_79 = arith.constant 3 : index
    %c10_80 = arith.constant 10 : index
    %181 = memref.load %arg2[%c3_79, %c10_80] : memref<4x16xf32, #tpu.memory_space<smem>>
    %182 = vector.broadcast %181 : f32 to vector<1x8x128xf32>
    %183 = arith.mulf %182, %168 : vector<1x8x128xf32>
    %184 = arith.addf %167, %183 : vector<1x8x128xf32>
    %185 = vector.extract_strided_slice %1 {offsets = [0, 0, 11], sizes = [1, 8, 128], strides = [1, 1, 1]} : vector<1x8x143xf32> to vector<1x8x128xf32>
    %c0_81 = arith.constant 0 : index
    %c11 = arith.constant 11 : index
    %186 = memref.load %arg2[%c0_81, %c11] : memref<4x16xf32, #tpu.memory_space<smem>>
    %187 = vector.broadcast %186 : f32 to vector<1x8x128xf32>
    %188 = arith.mulf %187, %185 : vector<1x8x128xf32>
    %189 = arith.addf %172, %188 : vector<1x8x128xf32>
    %c1_82 = arith.constant 1 : index
    %c11_83 = arith.constant 11 : index
    %190 = memref.load %arg2[%c1_82, %c11_83] : memref<4x16xf32, #tpu.memory_space<smem>>
    %191 = vector.broadcast %190 : f32 to vector<1x8x128xf32>
    %192 = arith.mulf %191, %185 : vector<1x8x128xf32>
    %193 = arith.addf %176, %192 : vector<1x8x128xf32>
    %c2_84 = arith.constant 2 : index
    %c11_85 = arith.constant 11 : index
    %194 = memref.load %arg2[%c2_84, %c11_85] : memref<4x16xf32, #tpu.memory_space<smem>>
    %195 = vector.broadcast %194 : f32 to vector<1x8x128xf32>
    %196 = arith.mulf %195, %185 : vector<1x8x128xf32>
    %197 = arith.addf %180, %196 : vector<1x8x128xf32>
    %c3_86 = arith.constant 3 : index
    %c11_87 = arith.constant 11 : index
    %198 = memref.load %arg2[%c3_86, %c11_87] : memref<4x16xf32, #tpu.memory_space<smem>>
    %199 = vector.broadcast %198 : f32 to vector<1x8x128xf32>
    %200 = arith.mulf %199, %185 : vector<1x8x128xf32>
    %201 = arith.addf %184, %200 : vector<1x8x128xf32>
    %202 = vector.extract_strided_slice %1 {offsets = [0, 0, 12], sizes = [1, 8, 128], strides = [1, 1, 1]} : vector<1x8x143xf32> to vector<1x8x128xf32>
    %c0_88 = arith.constant 0 : index
    %c12 = arith.constant 12 : index
    %203 = memref.load %arg2[%c0_88, %c12] : memref<4x16xf32, #tpu.memory_space<smem>>
    %204 = vector.broadcast %203 : f32 to vector<1x8x128xf32>
    %205 = arith.mulf %204, %202 : vector<1x8x128xf32>
    %206 = arith.addf %189, %205 : vector<1x8x128xf32>
    %c1_89 = arith.constant 1 : index
    %c12_90 = arith.constant 12 : index
    %207 = memref.load %arg2[%c1_89, %c12_90] : memref<4x16xf32, #tpu.memory_space<smem>>
    %208 = vector.broadcast %207 : f32 to vector<1x8x128xf32>
    %209 = arith.mulf %208, %202 : vector<1x8x128xf32>
    %210 = arith.addf %193, %209 : vector<1x8x128xf32>
    %c2_91 = arith.constant 2 : index
    %c12_92 = arith.constant 12 : index
    %211 = memref.load %arg2[%c2_91, %c12_92] : memref<4x16xf32, #tpu.memory_space<smem>>
    %212 = vector.broadcast %211 : f32 to vector<1x8x128xf32>
    %213 = arith.mulf %212, %202 : vector<1x8x128xf32>
    %214 = arith.addf %197, %213 : vector<1x8x128xf32>
    %c3_93 = arith.constant 3 : index
    %c12_94 = arith.constant 12 : index
    %215 = memref.load %arg2[%c3_93, %c12_94] : memref<4x16xf32, #tpu.memory_space<smem>>
    %216 = vector.broadcast %215 : f32 to vector<1x8x128xf32>
    %217 = arith.mulf %216, %202 : vector<1x8x128xf32>
    %218 = arith.addf %201, %217 : vector<1x8x128xf32>
    %219 = vector.extract_strided_slice %1 {offsets = [0, 0, 13], sizes = [1, 8, 128], strides = [1, 1, 1]} : vector<1x8x143xf32> to vector<1x8x128xf32>
    %c0_95 = arith.constant 0 : index
    %c13 = arith.constant 13 : index
    %220 = memref.load %arg2[%c0_95, %c13] : memref<4x16xf32, #tpu.memory_space<smem>>
    %221 = vector.broadcast %220 : f32 to vector<1x8x128xf32>
    %222 = arith.mulf %221, %219 : vector<1x8x128xf32>
    %223 = arith.addf %206, %222 : vector<1x8x128xf32>
    %c1_96 = arith.constant 1 : index
    %c13_97 = arith.constant 13 : index
    %224 = memref.load %arg2[%c1_96, %c13_97] : memref<4x16xf32, #tpu.memory_space<smem>>
    %225 = vector.broadcast %224 : f32 to vector<1x8x128xf32>
    %226 = arith.mulf %225, %219 : vector<1x8x128xf32>
    %227 = arith.addf %210, %226 : vector<1x8x128xf32>
    %c2_98 = arith.constant 2 : index
    %c13_99 = arith.constant 13 : index
    %228 = memref.load %arg2[%c2_98, %c13_99] : memref<4x16xf32, #tpu.memory_space<smem>>
    %229 = vector.broadcast %228 : f32 to vector<1x8x128xf32>
    %230 = arith.mulf %229, %219 : vector<1x8x128xf32>
    %231 = arith.addf %214, %230 : vector<1x8x128xf32>
    %c3_100 = arith.constant 3 : index
    %c13_101 = arith.constant 13 : index
    %232 = memref.load %arg2[%c3_100, %c13_101] : memref<4x16xf32, #tpu.memory_space<smem>>
    %233 = vector.broadcast %232 : f32 to vector<1x8x128xf32>
    %234 = arith.mulf %233, %219 : vector<1x8x128xf32>
    %235 = arith.addf %218, %234 : vector<1x8x128xf32>
    %236 = vector.extract_strided_slice %1 {offsets = [0, 0, 14], sizes = [1, 8, 128], strides = [1, 1, 1]} : vector<1x8x143xf32> to vector<1x8x128xf32>
    %c0_102 = arith.constant 0 : index
    %c14 = arith.constant 14 : index
    %237 = memref.load %arg2[%c0_102, %c14] : memref<4x16xf32, #tpu.memory_space<smem>>
    %238 = vector.broadcast %237 : f32 to vector<1x8x128xf32>
    %239 = arith.mulf %238, %236 : vector<1x8x128xf32>
    %240 = arith.addf %223, %239 : vector<1x8x128xf32>
    %c1_103 = arith.constant 1 : index
    %c14_104 = arith.constant 14 : index
    %241 = memref.load %arg2[%c1_103, %c14_104] : memref<4x16xf32, #tpu.memory_space<smem>>
    %242 = vector.broadcast %241 : f32 to vector<1x8x128xf32>
    %243 = arith.mulf %242, %236 : vector<1x8x128xf32>
    %244 = arith.addf %227, %243 : vector<1x8x128xf32>
    %c2_105 = arith.constant 2 : index
    %c14_106 = arith.constant 14 : index
    %245 = memref.load %arg2[%c2_105, %c14_106] : memref<4x16xf32, #tpu.memory_space<smem>>
    %246 = vector.broadcast %245 : f32 to vector<1x8x128xf32>
    %247 = arith.mulf %246, %236 : vector<1x8x128xf32>
    %248 = arith.addf %231, %247 : vector<1x8x128xf32>
    %c3_107 = arith.constant 3 : index
    %c14_108 = arith.constant 14 : index
    %249 = memref.load %arg2[%c3_107, %c14_108] : memref<4x16xf32, #tpu.memory_space<smem>>
    %250 = vector.broadcast %249 : f32 to vector<1x8x128xf32>
    %251 = arith.mulf %250, %236 : vector<1x8x128xf32>
    %252 = arith.addf %235, %251 : vector<1x8x128xf32>
    %253 = vector.extract_strided_slice %1 {offsets = [0, 0, 15], sizes = [1, 8, 128], strides = [1, 1, 1]} : vector<1x8x143xf32> to vector<1x8x128xf32>
    %c0_109 = arith.constant 0 : index
    %c15 = arith.constant 15 : index
    %254 = memref.load %arg2[%c0_109, %c15] : memref<4x16xf32, #tpu.memory_space<smem>>
    %255 = vector.broadcast %254 : f32 to vector<1x8x128xf32>
    %256 = arith.mulf %255, %253 : vector<1x8x128xf32>
    %257 = arith.addf %240, %256 : vector<1x8x128xf32>
    %c1_110 = arith.constant 1 : index
    %c15_111 = arith.constant 15 : index
    %258 = memref.load %arg2[%c1_110, %c15_111] : memref<4x16xf32, #tpu.memory_space<smem>>
    %259 = vector.broadcast %258 : f32 to vector<1x8x128xf32>
    %260 = arith.mulf %259, %253 : vector<1x8x128xf32>
    %261 = arith.addf %244, %260 : vector<1x8x128xf32>
    %c2_112 = arith.constant 2 : index
    %c15_113 = arith.constant 15 : index
    %262 = memref.load %arg2[%c2_112, %c15_113] : memref<4x16xf32, #tpu.memory_space<smem>>
    %263 = vector.broadcast %262 : f32 to vector<1x8x128xf32>
    %264 = arith.mulf %263, %253 : vector<1x8x128xf32>
    %265 = arith.addf %248, %264 : vector<1x8x128xf32>
    %c3_114 = arith.constant 3 : index
    %c15_115 = arith.constant 15 : index
    %266 = memref.load %arg2[%c3_114, %c15_115] : memref<4x16xf32, #tpu.memory_space<smem>>
    %267 = vector.broadcast %266 : f32 to vector<1x8x128xf32>
    %268 = arith.mulf %267, %253 : vector<1x8x128xf32>
    %269 = arith.addf %252, %268 : vector<1x8x128xf32>
    %270 = tpu.iota {dimensions = array<i32: 2>} : vector<1x8x128xi32>
    %c49_i32 = arith.constant 49 : i32
    %271 = vector.broadcast %c49_i32 : i32 to vector<1x8x128xi32>
    %272 = arith.cmpi slt, %270, %271 : vector<1x8x128xi32>
    %cst = arith.constant 0xFF800000 : f32
    %273 = vector.broadcast %cst : f32 to vector<1x8x128xf32>
    %274 = arith.select %272, %257, %273 : vector<1x8x128xi1>, vector<1x8x128xf32>
    %cst_116 = arith.constant dense<0xFF800000> : vector<1x8xf32>
    %275 = vector.multi_reduction <maximumf>, %274, %cst_116 [2] : vector<1x8x128xf32> to vector<1x8xf32>
    %276 = vector.shape_cast %275 : vector<1x8xf32> to vector<1x8x1xf32>
    %277 = vector.broadcast %276 : vector<1x8x1xf32> to vector<1x8x128xf32>
    %278 = arith.subf %274, %277 : vector<1x8x128xf32>
    %279 = math.exp %278 : vector<1x8x128xf32>
    %cst_117 = arith.constant dense<0.000000e+00> : vector<1x8xf32>
    %280 = vector.multi_reduction <add>, %279, %cst_117 [2] : vector<1x8x128xf32> to vector<1x8xf32>
    %281 = vector.shape_cast %280 : vector<1x8xf32> to vector<1x8x1xf32>
    %282 = vector.broadcast %276 : vector<1x8x1xf32> to vector<1x8x128xf32>
    %283 = arith.subf %257, %282 : vector<1x8x128xf32>
    %284 = math.log %281 : vector<1x8x1xf32>
    %285 = vector.broadcast %284 : vector<1x8x1xf32> to vector<1x8x128xf32>
    %286 = arith.subf %283, %285 : vector<1x8x128xf32>
    %c0_118 = arith.constant 0 : index
    %c0_119 = arith.constant 0 : index
    %c0_120 = arith.constant 0 : index
    %c0_121 = arith.constant 0 : index
    %287 = vector.load %arg3[%c0_118, %c0_119, %c0_120, %c0_121] : memref<1x4x8x128xf32, #tpu.memory_space<vmem>>, vector<1x1x8x128xf32>
    %288 = vector.shape_cast %287 : vector<1x1x8x128xf32> to vector<1x8x128xf32>
    %289 = vector.shape_cast %286 : vector<1x8x128xf32> to vector<1x1x8x128xf32>
    tpu.vector_store %arg3[%c0_118, %c0_119, %c0_120, %c0_121], %289 {strides = array<i32>} : memref<1x4x8x128xf32, #tpu.memory_space<vmem>>, vector<1x1x8x128xf32>,
    %cst_122 = arith.constant 0xFF800000 : f32
    %290 = vector.broadcast %cst_122 : f32 to vector<1x8x128xf32>
    %291 = arith.select %272, %261, %290 : vector<1x8x128xi1>, vector<1x8x128xf32>
    %cst_123 = arith.constant dense<0xFF800000> : vector<1x8xf32>
    %292 = vector.multi_reduction <maximumf>, %291, %cst_123 [2] : vector<1x8x128xf32> to vector<1x8xf32>
    %293 = vector.shape_cast %292 : vector<1x8xf32> to vector<1x8x1xf32>
    %294 = vector.broadcast %293 : vector<1x8x1xf32> to vector<1x8x128xf32>
    %295 = arith.subf %291, %294 : vector<1x8x128xf32>
    %296 = math.exp %295 : vector<1x8x128xf32>
    %cst_124 = arith.constant dense<0.000000e+00> : vector<1x8xf32>
    %297 = vector.multi_reduction <add>, %296, %cst_124 [2] : vector<1x8x128xf32> to vector<1x8xf32>
    %298 = vector.shape_cast %297 : vector<1x8xf32> to vector<1x8x1xf32>
    %299 = vector.broadcast %293 : vector<1x8x1xf32> to vector<1x8x128xf32>
    %300 = arith.subf %261, %299 : vector<1x8x128xf32>
    %301 = math.log %298 : vector<1x8x1xf32>
    %302 = vector.broadcast %301 : vector<1x8x1xf32> to vector<1x8x128xf32>
    %303 = arith.subf %300, %302 : vector<1x8x128xf32>
    %c0_125 = arith.constant 0 : index
    %c1_126 = arith.constant 1 : index
    %c0_127 = arith.constant 0 : index
    %c0_128 = arith.constant 0 : index
    %304 = vector.load %arg3[%c0_125, %c1_126, %c0_127, %c0_128] : memref<1x4x8x128xf32, #tpu.memory_space<vmem>>, vector<1x1x8x128xf32>
    %305 = vector.shape_cast %304 : vector<1x1x8x128xf32> to vector<1x8x128xf32>
    %306 = vector.shape_cast %303 : vector<1x8x128xf32> to vector<1x1x8x128xf32>
    tpu.vector_store %arg3[%c0_125, %c1_126, %c0_127, %c0_128], %306 {strides = array<i32>} : memref<1x4x8x128xf32, #tpu.memory_space<vmem>>, vector<1x1x8x128xf32>,
    %cst_129 = arith.constant 0xFF800000 : f32
    %307 = vector.broadcast %cst_129 : f32 to vector<1x8x128xf32>
    %308 = arith.select %272, %265, %307 : vector<1x8x128xi1>, vector<1x8x128xf32>
    %cst_130 = arith.constant dense<0xFF800000> : vector<1x8xf32>
    %309 = vector.multi_reduction <maximumf>, %308, %cst_130 [2] : vector<1x8x128xf32> to vector<1x8xf32>
    %310 = vector.shape_cast %309 : vector<1x8xf32> to vector<1x8x1xf32>
    %311 = vector.broadcast %310 : vector<1x8x1xf32> to vector<1x8x128xf32>
    %312 = arith.subf %308, %311 : vector<1x8x128xf32>
    %313 = math.exp %312 : vector<1x8x128xf32>
    %cst_131 = arith.constant dense<0.000000e+00> : vector<1x8xf32>
    %314 = vector.multi_reduction <add>, %313, %cst_131 [2] : vector<1x8x128xf32> to vector<1x8xf32>
    %315 = vector.shape_cast %314 : vector<1x8xf32> to vector<1x8x1xf32>
    %316 = vector.broadcast %310 : vector<1x8x1xf32> to vector<1x8x128xf32>
    %317 = arith.subf %265, %316 : vector<1x8x128xf32>
    %318 = math.log %315 : vector<1x8x1xf32>
    %319 = vector.broadcast %318 : vector<1x8x1xf32> to vector<1x8x128xf32>
    %320 = arith.subf %317, %319 : vector<1x8x128xf32>
    %c0_132 = arith.constant 0 : index
    %c2_133 = arith.constant 2 : index
    %c0_134 = arith.constant 0 : index
    %c0_135 = arith.constant 0 : index
    %321 = vector.load %arg3[%c0_132, %c2_133, %c0_134, %c0_135] : memref<1x4x8x128xf32, #tpu.memory_space<vmem>>, vector<1x1x8x128xf32>
    %322 = vector.shape_cast %321 : vector<1x1x8x128xf32> to vector<1x8x128xf32>
    %323 = vector.shape_cast %320 : vector<1x8x128xf32> to vector<1x1x8x128xf32>
    tpu.vector_store %arg3[%c0_132, %c2_133, %c0_134, %c0_135], %323 {strides = array<i32>} : memref<1x4x8x128xf32, #tpu.memory_space<vmem>>, vector<1x1x8x128xf32>,
    %cst_136 = arith.constant 0xFF800000 : f32
    %324 = vector.broadcast %cst_136 : f32 to vector<1x8x128xf32>
    %325 = arith.select %272, %269, %324 : vector<1x8x128xi1>, vector<1x8x128xf32>
    %cst_137 = arith.constant dense<0xFF800000> : vector<1x8xf32>
    %326 = vector.multi_reduction <maximumf>, %325, %cst_137 [2] : vector<1x8x128xf32> to vector<1x8xf32>
    %327 = vector.shape_cast %326 : vector<1x8xf32> to vector<1x8x1xf32>
    %328 = vector.broadcast %327 : vector<1x8x1xf32> to vector<1x8x128xf32>
    %329 = arith.subf %325, %328 : vector<1x8x128xf32>
    %330 = math.exp %329 : vector<1x8x128xf32>
    %cst_138 = arith.constant dense<0.000000e+00> : vector<1x8xf32>
    %331 = vector.multi_reduction <add>, %330, %cst_138 [2] : vector<1x8x128xf32> to vector<1x8xf32>
    %332 = vector.shape_cast %331 : vector<1x8xf32> to vector<1x8x1xf32>
    %333 = vector.broadcast %327 : vector<1x8x1xf32> to vector<1x8x128xf32>
    %334 = arith.subf %269, %333 : vector<1x8x128xf32>
    %335 = math.log %332 : vector<1x8x1xf32>
    %336 = vector.broadcast %335 : vector<1x8x1xf32> to vector<1x8x128xf32>
    %337 = arith.subf %334, %336 : vector<1x8x128xf32>
    %c0_139 = arith.constant 0 : index
    %c3_140 = arith.constant 3 : index
    %c0_141 = arith.constant 0 : index
    %c0_142 = arith.constant 0 : index
    %338 = vector.load %arg3[%c0_139, %c3_140, %c0_141, %c0_142] : memref<1x4x8x128xf32, #tpu.memory_space<vmem>>, vector<1x1x8x128xf32>
    %339 = vector.shape_cast %338 : vector<1x1x8x128xf32> to vector<1x8x128xf32>
    %340 = vector.shape_cast %337 : vector<1x8x128xf32> to vector<1x1x8x128xf32>
    tpu.vector_store %arg3[%c0_139, %c3_140, %c0_141, %c0_142], %340 {strides = array<i32>} : memref<1x4x8x128xf32, #tpu.memory_space<vmem>>, vector<1x1x8x128xf32>,
    return
  }
  func.func @transform_0(%arg0: i32) -> (i32, i32, i32, i32) {
    %c0_i32 = arith.constant 0 : i32
    %c0_i32_0 = arith.constant 0 : i32
    %c0_i32_1 = arith.constant 0 : i32
    %c0_i32_2 = arith.constant 0 : i32
    return %arg0, %c0_i32, %c0_i32_0, %c0_i32_1 : i32, i32, i32, i32
  }
  func.func @transform_1(%arg0: i32) -> (i32, i32) {
    %c0_i32 = arith.constant 0 : i32
    %c0_i32_0 = arith.constant 0 : i32
    %c0_i32_1 = arith.constant 0 : i32
    return %c0_i32, %c0_i32_0 : i32, i32
  }
  func.func @transform_2(%arg0: i32) -> (i32, i32, i32, i32) {
    %c0_i32 = arith.constant 0 : i32
    %c0_i32_0 = arith.constant 0 : i32
    %c0_i32_1 = arith.constant 0 : i32
    %c0_i32_2 = arith.constant 0 : i32
    return %arg0, %c0_i32, %c0_i32_0, %c0_i32_1 : i32, i32, i32, i32
  }
}

</mosaic_0001>

<bundles_post_ra>
// kernel: tpu_custom_call.1
= control target key start
LH: loop header
LB: loop body
LE: loop exit
PB: predicated region body
PF: predicated region fallthrough
CT: control target
= control target key end

     0   :  { %7 = vsyncpa [#allocation3], 0  ;;  %s1979_s0 = inlined_call_operand.hbm [shape: f32[2,1,8,143], index: 0, kind: input, shape index: {}]   ;;  %s1980_s1 = inlined_call_operand.hbm [shape: f32[4,16], index: 1, kind: input, shape index: {}]   ;;  %s1981_s2 = inlined_call_operand.hbm [shape: f32[2,4,8,128], index: 2, kind: output, shape index: {}]  }
   0x1   :  { %9 = vsyncpa [#allocation3 + $0x1], 0 }
   0x2   :  { %10 = vsyncpa [#allocation5], 0 }
   0x3   :  { %11 = vsyncpa [#allocation4], 0 }
   0x4   :  { %13 = vsyncpa [#allocation4 + $0x1], 0  ;;  %s1456_s9 = smov 0   ;;  %s1458_s10 = smov 0  }
   0x5   :  { %s1460_s11 = smov 0   ;;  %s1462_s12 = smov 0  }
   0x6 LB: > { %s1477_s13 = sadd.s32 4294967295, %s1419_s12   ;;  %s1138_s14 = sadd.s32 4294967294, %s1419_s12   ;;  %s1419_s12 = sphi %s1462_s12, %s2001_s12   ;;  %s1415_s11 = sphi %s1460_s11, %s2000_s11   ;;  %s1411_s10 = sphi %s1458_s10, %s1999_s10   ;;  %s1407_s9 = sphi %s1456_s9, %s1998_s9  }
   0x7   : > { %p39_p0 = scmp.ne.s32.totalorder %s1411_s10, %s1407_s9  ;;  %p1982_p1 = scmp.eq.s32.totalorder %s1477_s13, 0 }
   0x8   : > { %p84_p2 = scmp.eq.s32.totalorder %s1477_s13, 1  ;;  %p90_p3 = scmp.eq.s32.totalorder %s1138_s14, 1 }
   0x9   : > { %p1486_p4 = por %p1982_p1, %p39_p0  ;;  %p1139_p5 = scmp.ge.s32.totalorder %s1419_s12, 1 }
   0xa   : > { %p1491_p6 = por %p90_p3, %p39_p0  ;;  %p97_p7 = scmp.lt.s32.totalorder %s1419_s12, 3 }
   0xb   : > { %s1986_s15 = scalar_select %p1486_p4, 1, 0 }
   0xc   : > { %s1987_s16 = scalar_select %p1491_p6, 1, 0 }
   0xd   : > { %p1496_p8 = pnand %p1139_p5, %p97_p7  ;;  %s1502_s18 = sadd.s32 1, %s1419_s12  }
   0xe   : > { %s23_s19 = ssub.s32 %s1419_s12, %s1502_s18  ;;  %s26_s20 = sadd.s32 1, %s1415_s11 }
   0xf   : > { %s1988_s17 = scalar_select %p1496_p8, 1, 0 }
  0x10   : > { %p1230_p10 = pneg %p1496_p8  ;;  %p24_p12 = scmp.eq.s32.totalorder %s23_s19, 0 }
  0x11   : > { %p33_p13 = scmp.ne.s32.totalorder %s1415_s11, %s1411_s10  ;;  %p34_p0 = scmp.eq.s32.totalorder %s1419_s12, 0 }
  0x12   : > { %p1231_p11 = pnand %p1230_p10, %p1982_p1  ;;  %p1243_p3 = scmp.lt.s32.totalorder %s1419_s12, 2 }
  0x13   : > { %s1421_s21 = smov [#allocation6]   ;;  %p35_p5 = por %p34_p0, %p33_p13 }
  0x14   : > { %1233 = dma.hbm_to_smem (!%p1231_p11), %s1980_s1, 64, %s1421_s21, [#allocation5]  }
  0x15   : > { %s1519_s24 = scalar_select %p24_p12, %s1415_s11, %s26_s20  }
  0x16   : > { %p1523_p7 = por %p84_p2, %p33_p13  ;;  %s119_s26 = sand.u32 1, %s1415_s11  }
  0x17   : > { %s1220_s27 = sshll.u32 %s1419_s12, 8  ;;  %s1142_s28 = sshll.u32 %s119_s26, 4 }
  0x18   : > { %s1989_s25 = scalar_select %p1523_p7, 1, 0 }
  0x19   : > { %s1532_s3 = scalar_lea.hbm %s1979_s0, %s1220_s27  ;;  %s123_s4 = scalar_lea.vmem [#allocation2], %s1142_s28 }
  0x1a   : > { %s131_s5 = sshll.u32 %s123_s4, 4  ;;  %p1534_p10 = pnand %p1243_p3, %p35_p5  ;;  %s132_s5 = int_to_ptr.vmem [resolvable:$true] %s131_s5 }
  0x1b   : > { %s120_s7 = scalar_lea.sflag [#allocation3], %s119_s26  ;;  %s1323_s8 = scalar_lea.hbm %s1532_s3, 256 }
  0x1c   : > { %p1324_p2 = scmp.ne.s32.totalorder %s1532_s3, %s1323_s8  ;;  %p1325_p11 = pneg %p1534_p10 }
  0x1d   : > { %s1328_s20 = scalar_lea.hbm %s1979_s0, 512  ;;  %p1329_p0 = scmp.lt.s32.totalorder %s1532_s3, %s1979_s0 }
  0x1e   : > { %p1326_p12 = pnand %p1325_p11, %p1324_p2  ;;  %p1330_p3 = scmp.lt.s32.totalorder %s1328_s20, %s1323_s8 }
  0x20   : > { %p1327_p13 = pneg %p1326_p12  ;;  %p1331_p5 = por %p1330_p3, %p1329_p0 }
  0x22   : > { %p1332_p9 = pnand %p1331_p5, %p1327_p13 }
  0x24   : > { %1335 = shalt.err (!%p1332_p9)
}
  0x25   : > { %s1336_s23 = scalar_lea.vmem %s132_s5, 256  ;;  %s1422_s26 = smov [#allocation2]  }
  0x26   : > { %p1337_p1 = scmp.ne.s32.totalorder %s132_s5, %s1336_s23  ;;  %s1341_s27 = sshll.u32 %s1422_s26, 4  ;;  %s1342_s27 = int_to_ptr.vmem [resolvable:$false] %s1341_s27 }
  0x27   : > { %s1343_s28 = scalar_lea.vmem %s1342_s27, 512  ;;  %p1344_p2 = scmp.lt.s32.totalorder %s132_s5, %s1342_s27 }
  0x28   : > { %p1339_p6 = pnand %p1337_p1, %p1325_p11  ;;  %p1345_p12 = scmp.lt.s32.totalorder %s1343_s28, %s1336_s23 }
  0x2a   : > { %p1340_p7 = pneg %p1339_p6  ;;  %p1346_p4 = por %p1345_p12, %p1344_p2 }
  0x2c   : > { %p1347_p8 = pnand %p1346_p4, %p1340_p7 }
  0x2e   : > { %1350 = shalt.err (!%p1347_p8)
}
  0x2f   : > { %1237 = dma.hbm_to_vmem [thread:$0]  (!%p1534_p10), %s1532_s3, 256, %s132_s5, %s120_s7  }
  0x30   : > { %p1991_p13 = scmp.ne.s32.totalorder %s1988_s17, 0 }
  0x31   : > { %s1555_s29 = sand.u32 (!%p1991_p13), 1, %s1411_s10   ;;  %p1992_p1 = scmp.ne.s32.totalorder (!%p1991_p13), %s1986_s15, 0 }
  0x32   : > { %140 = sbr.rel (%p1991_p13) target bundleno = 753 (0x2f1), region = 28  ;;  %s1146_s30 = sshll.u32 (!%p1991_p13), %s1555_s29, 4 }
  0x33   : > { %s143_s4 = scalar_lea.sflag (!%p1991_p13), [#allocation3], %s1555_s29  ;;  %s146_s8 = scalar_lea.vmem (!%p1991_p13), [#allocation2], %s1146_s30 }
  0x37   : > { %1394 = dma.done.wait (%p1992_p1), %s143_s4, 256  }
  0x38   : > { %1396 = vsyncadd (%p1992_p1), %s143_s4, 4294967040  ;;  %p1993_p4 = scmp.eq.s32.totalorder %s1477_s13, 0 }
  0x3a   : > { %1398 = dma.done.wait (%p1993_p4), [#allocation5], 64   ;;  %p1994_p6 = pmov %p1993_p4 }
  0x3c   : > { %1400 = vsyncadd (%p1994_p6), [#allocation5], 4294967232 }
  0x3d   : > { %155 = sfence }
  0x3e   : > { %s1153_s17 = sld [smem:[#allocation6 + $0x81]]  ;;  %v1567_v0 = vld [vmem:[%s146_s8] sm:$0xff]  ;;  %v1569_v1 = vld [vmem:[%s146_s8 + $0x8] sm:$0xff]  ;;  %s1423_s15 = smov 127   ;;  %vm196_vm0 = vcmask 1039360   ;;  %vm408_vm1 = vcmask 1006592  }
  0x3f   : > { %s1152_s3 = sld [smem:[#allocation6 + $0x1]]  ;;  %s1424_s21 = smov 126   ;;  %vm249_vm2 = vcmask 1031168   ;;  %vm302_vm3 = vcmask 1022976   ;;  %vm355_vm4 = vcmask 1014784   ;;  %vm461_vm5 = vcmask 998400  }
  0x40   : > { %s1154_s5 = sld [smem:[#allocation6 + $0x101]]  ;;  %s1425_s28 = smov 125   ;;  %vm514_vm6 = vcmask 990208   ;;  %vm567_vm7 = vcmask 982016   ;;  %vm620_vm8 = vcmask 973824   ;;  %vm673_vm9 = vcmask 965632  }
  0x41   : > { %s1155_s6 = sld [smem:[#allocation6 + $0x181]]  ;;  %vm726_vm10 = vcmask 957440   ;;  %vm779_vm11 = vcmask 949248   ;;  %vm832_vm12 = vcmask 941056   ;;  %vm885_vm13 = vcmask 932864   ;;  %p1995_p9 = scmp.ne.s32.totalorder %s1989_s25, 0 }
  0x42   : > { %s1156_s7 = sld [smem:[#allocation6 + $0x2]]  ;;  %vm938_vm14 = vcmask 924672  }
  0x43   : > { %s1157_s14 = sld [smem:[#allocation6 + $0x82]] }
  0x44   : > { %v201_v2 = vstv %s1153_s17  ;;  %s1158_s19 = sld [smem:[#allocation6 + $0x102]] }
  0x45   : > { %v202_v3 = vmul.f32 %v201_v2, %v1567_v0  ;;  %v187_v4 = vstv %s1152_s3  ;;  %v203_v6 = vmul.f32 %v201_v2, %v1569_v1  ;;  %s1159_s20 = sld [smem:[#allocation6 + $0x182]]  ;;  %s1426_s3 = smov 124  }
  0x46   : > { %v188_v5 = vmul.f32 %v187_v4, %v1567_v0  ;;  %v189_v7 = vmul.f32 %v187_v4, %v1569_v1  ;;  %v214_v8 = vstv %s1154_s5  ;;  %s1160_s22 = sld [smem:[#allocation6 + $0x3]] }
  0x47   : > { %206 = vrot.lane.b32.xlu1 %v202_v3, %s1423_s15  ;;  %v216_v9 = vmul.f32 %v214_v8, %v1569_v1  ;;  %v215_v10 = vmul.f32 %v214_v8, %v1567_v0  ;;  %v227_v11 = vstv %s1155_s6  ;;  %s1161_s23 = sld [smem:[#allocation6 + $0x83]] }
  0x48   : > { %192 = vrot.lane.b32.xlu0 %v188_v5, %s1423_s15  ;;  %v229_v12 = vmul.f32 %v227_v11, %v1569_v1  ;;  %v228_v13 = vmul.f32 %v227_v11, %v1567_v0  ;;  %v240_v14 = vstv %s1156_s7  ;;  %s1162_s26 = sld [smem:[#allocation6 + $0x103]] }
  0x49   : > { %v242_v15 = vmul.f32 %v240_v14, %v1569_v1  ;;  %v241_v16 = vmul.f32 %v240_v14, %v1567_v0  ;;  %v254_v17 = vstv %s1157_s14  ;;  %s1163_s27 = sld [smem:[#allocation6 + $0x183]]  ;;  %s1427_s14 = smov 123  }
  0x4a   : > { %v256_v18 = vmul.f32 %v254_v17, %v1569_v1  ;;  %v255_v19 = vmul.f32 %v254_v17, %v1567_v0  ;;  %v267_v20 = vstv %s1158_s19  ;;  %s1164_s30 = sld [smem:[#allocation6 + $0x4]] }
  0x4b   : > { %208 = vrot.lane.b32.xlu1 %v203_v6, %s1423_s15  ;;  %v269_v21 = vmul.f32 %v267_v20, %v1569_v1  ;;  %v268_v22 = vmul.f32 %v267_v20, %v1567_v0  ;;  %v280_v23 = vstv %s1159_s20  ;;  %s1165_s4 = sld [smem:[#allocation6 + $0x84]] }
  0x4c   : > { %194 = vrot.lane.b32.xlu0 %v189_v7, %s1423_s15  ;;  %v282_v24 = vmul.f32 %v280_v23, %v1569_v1  ;;  %v281_v25 = vmul.f32 %v280_v23, %v1567_v0  ;;  %v293_v26 = vstv %s1160_s22  ;;  %s1166_s8 = sld [smem:[#allocation6 + $0x104]] }
  0x4d   : > { %v295_v27 = vmul.f32 %v293_v26, %v1569_v1  ;;  %v294_v28 = vmul.f32 %v293_v26, %v1567_v0  ;;  %v307_v29 = vstv %s1161_s23  ;;  %s1167_s17 = sld [smem:[#allocation6 + $0x184]]  ;;  %s1428_s23 = smov 122  }
  0x4e   : > { %v309_v30 = vmul.f32 %v307_v29, %v1569_v1  ;;  %v308_v31 = vmul.f32 %v307_v29, %v1567_v0  ;;  %v320_v32 = vstv %s1162_s26  ;;  %s1168_s5 = sld [smem:[#allocation6 + $0x5]] }
  0x4f   : > { %221 = vrot.lane.b32.xlu1 %v216_v9, %s1423_s15  ;;  %v322_v33 = vmul.f32 %v320_v32, %v1569_v1  ;;  %v321_v34 = vmul.f32 %v320_v32, %v1567_v0  ;;  %v333_v35 = vstv %s1163_s27  ;;  %s1169_s6 = sld [smem:[#allocation6 + $0x85]] }
  0x50   : > { %219 = vrot.lane.b32.xlu0 %v215_v10, %s1423_s15  ;;  %v335_v36 = vmul.f32 %v333_v35, %v1569_v1  ;;  %v334_v37 = vmul.f32 %v333_v35, %v1567_v0  ;;  %v346_v38 = vstv %s1164_s30  ;;  %s1171_s7 = sld [smem:[#allocation6 + $0x185]] }
  0x51   : > { %v348_v39 = vmul.f32 %v346_v38, %v1569_v1  ;;  %v347_v40 = vmul.f32 %v346_v38, %v1567_v0  ;;  %v360_v41 = vstv %s1165_s4  ;;  %s1172_s19 = sld [smem:[#allocation6 + $0x6]]  ;;  %s1429_s4 = smov 121  }
  0x52   : > { %v362_v42 = vmul.f32 %v360_v41, %v1569_v1  ;;  %v361_v43 = vmul.f32 %v360_v41, %v1567_v0  ;;  %v373_v44 = vstv %s1166_s8  ;;  %s1173_s20 = sld [smem:[#allocation6 + $0x86]] }
  0x53   : > { %234 = vrot.lane.b32.xlu1 %v229_v12, %s1423_s15  ;;  %v375_v45 = vmul.f32 %v373_v44, %v1569_v1  ;;  %v374_v46 = vmul.f32 %v373_v44, %v1567_v0  ;;  %v386_v47 = vstv %s1167_s17  ;;  %s1175_s22 = sld [smem:[#allocation6 + $0x186]] }
  0x54   : > { %232 = vrot.lane.b32.xlu0 %v228_v13, %s1423_s15  ;;  %v388_v48 = vmul.f32 %v386_v47, %v1569_v1  ;;  %v387_v49 = vmul.f32 %v386_v47, %v1567_v0  ;;  %v399_v50 = vstv %s1168_s5  ;;  %s1170_s15 = sld [smem:[#allocation6 + $0x105]] }
  0x55   : > { %v401_v51 = vmul.f32 %v399_v50, %v1569_v1  ;;  %v400_v52 = vmul.f32 %v399_v50, %v1567_v0  ;;  %v413_v53 = vstv %s1169_s6  ;;  %s1176_s26 = sld [smem:[#allocation6 + $0x7]]  ;;  %s1430_s6 = smov 120  }
  0x56   : > { %v415_v54 = vmul.f32 %v413_v53, %v1569_v1  ;;  %v414_v55 = vmul.f32 %v413_v53, %v1567_v0  ;;  %v439_v59 = vstv %s1171_s7  ;;  %s1177_s27 = sld [smem:[#allocation6 + $0x87]] }
  0x57   : > { %247 = vrot.lane.b32.xlu1 %v242_v15, %s1424_s21  ;;  %v441_v60 = vmul.f32 %v439_v59, %v1569_v1  ;;  %v440_v61 = vmul.f32 %v439_v59, %v1567_v0  ;;  %v452_v62 = vstv %s1172_s19  ;;  %s1179_s30 = sld [smem:[#allocation6 + $0x187]] }
  0x58   : > { %245 = vrot.lane.b32.xlu0 %v241_v16, %s1424_s21  ;;  %v454_v63 = vmul.f32 %v452_v62, %v1569_v1  ;;  %v453_v2 = vmul.f32 %v452_v62, %v1567_v0  ;;  %v466_v3 = vstv %s1173_s20  ;;  %s1180_s8 = sld [smem:[#allocation6 + $0x8]]  ;;  %s1431_s20 = smov 119  }
  0x59   : > { %v468_v4 = vmul.f32 %v466_v3, %v1569_v1  ;;  %v467_v5 = vmul.f32 %v466_v3, %v1567_v0  ;;  %v492_v9 = vstv %s1175_s22  ;;  %s1181_s17 = sld [smem:[#allocation6 + $0x88]] }
  0x5a   : > { %v426_v56 = vstv %s1170_s15  ;;  %v494_v10 = vmul.f32 %v492_v9, %v1569_v1  ;;  %v493_v11 = vmul.f32 %v492_v9, %v1567_v0  ;;  %s1183_s5 = sld [smem:[#allocation6 + $0x188]] }
  0x5b   : > { %261 = vrot.lane.b32.xlu1 %v256_v18, %s1424_s21  ;;  %v428_v57 = vmul.f32 %v426_v56, %v1569_v1  ;;  %v427_v58 = vmul.f32 %v426_v56, %v1567_v0  ;;  %v505_v12 = vstv %s1176_s26  ;;  %s1184_s15 = sld [smem:[#allocation6 + $0x9]] }
  0x5c   : > { %259 = vrot.lane.b32.xlu0 %v255_v19, %s1424_s21  ;;  %v507_v13 = vmul.f32 %v505_v12, %v1569_v1  ;;  %v506_v14 = vmul.f32 %v505_v12, %v1567_v0  ;;  %v519_v15 = vstv %s1177_s27  ;;  %s1185_s7 = sld [smem:[#allocation6 + $0x89]]  ;;  %s1432_s27 = smov 118  }
  0x5d   : > { %v521_v16 = vmul.f32 %v519_v15, %v1569_v1  ;;  %v520_v17 = vmul.f32 %v519_v15, %v1567_v0  ;;  %s1187_s19 = sld [smem:[#allocation6 + $0x189]] }
  0x5e   : > { %s1189_s22 = sld [smem:[#allocation6 + $0x8a]] }
  0x5f   : > { %274 = vrot.lane.b32.xlu1 %v269_v21, %s1424_s21  ;;  %v545_v21 = vstv %s1179_s30  ;;  %s1191_s26 = sld [smem:[#allocation6 + $0x18a]] }
  0x60   : > { %272 = vrot.lane.b32.xlu0 %v268_v22, %s1424_s21  ;;  %v547_v22 = vmul.f32 %v545_v21, %v1569_v1  ;;  %v546_v23 = vmul.f32 %v545_v21, %v1567_v0  ;;  %v598_v35 = vstv %s1183_s5  ;;  %s1193_s30 = sld [smem:[#allocation6 + $0x8b]] }
  0x61   : > { %v600_v38 = vmul.f32 %v598_v35, %v1569_v1  ;;  %s1713_s5 = sld [smem:[#allocation6 + $0x8c]] }
  0x63   : > { %287 = vrot.lane.b32.xlu1 %v282_v24, %s1424_s21  ;;  %v558_v24 = vstv %s1180_s8  ;;  %s1195_s8 = sld [smem:[#allocation6 + $0x18b]] }
  0x64   : > { %285 = vrot.lane.b32.xlu0 %v281_v25, %s1424_s21  ;;  %s1174_s21 = sld [smem:[#allocation6 + $0x106]]  ;;  %v560_v25 = vmul.f32 %v558_v24, %v1569_v1  ;;  %v559_v26 = vmul.f32 %v558_v24, %v1567_v0  ;;  %v678_v3 = vstv %s1189_s22  ;;  %s1434_s22 = smov 116  }
  0x67   : > { %300 = vrot.lane.b32.xlu1 %v295_v27, %s1425_s28  ;;  %v572_v27 = vstv %s1181_s17  ;;  %s1433_s17 = smov 117  }
  0x68   : > { %298 = vrot.lane.b32.xlu0 %v294_v28, %s1425_s28  ;;  %v574_v28 = vmul.f32 %v572_v27, %v1569_v1  ;;  %v573_v29 = vmul.f32 %v572_v27, %v1567_v0 }
  0x6a   : > { %v479_v6 = vstv %s1174_s21  ;;  %s1188_s21 = sld [smem:[#allocation6 + $0xa]] }
  0x6b   : > { %314 = vrot.lane.b32.xlu1 %v309_v30, %s1425_s28  ;;  %v481_v7 = vmul.f32 %v479_v6, %v1569_v1  ;;  %v480_v8 = vmul.f32 %v479_v6, %v1567_v0  ;;  %v680_v6 = vmul.f32 %v678_v3, %v1569_v1 }
  0x6c   : > { %312 = vrot.lane.b32.xlu0 %v308_v31, %s1425_s28 }
  0x6f   : > { %327 = vrot.lane.b32.xlu1 %v322_v33, %s1425_s28 }
  0x70   : > { %325 = vrot.lane.b32.xlu0 %v321_v34, %s1425_s28 }
  0x73   : > { %340 = vrot.lane.b32.xlu1 %v335_v36, %s1425_s28 }
  0x74   : > { %338 = vrot.lane.b32.xlu0 %v334_v37, %s1425_s28  ;;  %s1178_s28 = sld [smem:[#allocation6 + $0x107]] }
  0x77   : > { %353 = vrot.lane.b32.xlu1 %v348_v39, %s1426_s3  ;;  %v599_v39 = vmul.f32 %v598_v35, %v1567_v0  ;;  %v757_v35 = vstv %s1195_s8  ;;  %s1848_s8 = sld [smem:[#allocation6 + $0x10e]] }
  0x78   : > { %351 = vrot.lane.b32.xlu0 %v347_v40, %s1426_s3  ;;  %v611_v40 = vstv %s1184_s15  ;;  %s1723_s15 = sld [smem:[#allocation6 + $0x10c]] }
  0x79   : > { %v612_v44 = vmul.f32 %v611_v40, %v1567_v0 }
  0x7a   : > { %v532_v18 = vstv %s1178_s28  ;;  %s1192_s28 = sld [smem:[#allocation6 + $0xb]] }
  0x7b   : > { %367 = vrot.lane.b32.xlu1 %v362_v42, %s1426_s3  ;;  %v534_v19 = vmul.f32 %v532_v18, %v1569_v1  ;;  %v533_v20 = vmul.f32 %v532_v18, %v1567_v0 }
  0x7c   : > { %365 = vrot.lane.b32.xlu0 %v361_v43, %s1426_s3  ;;  %v613_v43 = vmul.f32 %v611_v40, %v1569_v1  ;;  %v759_v40 = vmul.f32 %v757_v35, %v1569_v1 }
  0x7f   : > { %380 = vrot.lane.b32.xlu1 %v375_v45, %s1426_s3  ;;  %v625_v45 = vstv %s1185_s7  ;;  %s1725_s7 = sld [smem:[#allocation6 + $0x180]] }
  0x80   : > { %378 = vrot.lane.b32.xlu0 %v374_v46, %s1426_s3  ;;  %v717_v18 = vstv %s1192_s28  ;;  %s1435_s28 = smov 115  }
  0x81   : > { %v719_v21 = vmul.f32 %v717_v18, %v1569_v1 }
  0x83   : > { %393 = vrot.lane.b32.xlu1 %v388_v48, %s1426_s3  ;;  %v627_v48 = vmul.f32 %v625_v45, %v1569_v1 }
  0x84   : > { %391 = vrot.lane.b32.xlu0 %v387_v49, %s1426_s3  ;;  %s1182_s3 = sld [smem:[#allocation6 + $0x108]]  ;;  %v626_v49 = vmul.f32 %v625_v45, %v1567_v0 }
  0x87   : > { %406 = vrot.lane.b32.xlu1 %v401_v51, %s1427_s14 }
  0x88   : > { %404 = vrot.lane.b32.xlu0 %v400_v52, %s1427_s14 }
  0x8a   : > { %v585_v30 = vstv %s1182_s3  ;;  %s1196_s3 = sld [smem:[#allocation6 + $0xc]] }
  0x8b   : > { %420 = vrot.lane.b32.xlu1 %v415_v54, %s1427_s14  ;;  %v587_v33 = vmul.f32 %v585_v30, %v1569_v1  ;;  %v586_v34 = vmul.f32 %v585_v30, %v1567_v0 }
  0x8c   : > { %418 = vrot.lane.b32.xlu0 %v414_v55, %s1427_s14  ;;  %v651_v55 = vstv %s1187_s19  ;;  %s1731_s19 = sld [smem:[#allocation6 + $0x18c]] }
  0x8d   : > { %v652_v59 = vmul.f32 %v651_v55, %v1567_v0 }
  0x8f   : > { %433 = vrot.lane.b32.xlu1 %v428_v57, %s1427_s14 }
  0x90   : > { %431 = vrot.lane.b32.xlu0 %v427_v58, %s1427_s14  ;;  %v653_v58 = vmul.f32 %v651_v55, %v1569_v1 }
  0x93   : > { %446 = vrot.lane.b32.xlu1 %v441_v60, %s1427_s14  ;;  %v664_v60 = vstv %s1188_s21  ;;  %s1738_s21 = sld [smem:[#allocation6 + $0xd]] }
  0x94   : > { %444 = vrot.lane.b32.xlu0 %v440_v61, %s1427_s14  ;;  %s1186_s14 = sld [smem:[#allocation6 + $0x109]] }
  0x97   : > { %459 = vrot.lane.b32.xlu1 %v454_v63, %s1428_s23  ;;  %v666_v63 = vmul.f32 %v664_v60, %v1569_v1 }
  0x98   : > { %457 = vrot.lane.b32.xlu0 %v453_v2, %s1428_s23  ;;  %v665_v2 = vmul.f32 %v664_v60, %v1567_v0 }
  0x9a   : > { %v638_v50 = vstv %s1186_s14  ;;  %s1727_s14 = sld [smem:[#allocation6]] }
  0x9b   : > { %473 = vrot.lane.b32.xlu1 %v468_v4, %s1428_s23  ;;  %v640_v53 = vmul.f32 %v638_v50, %v1569_v1  ;;  %v639_v54 = vmul.f32 %v638_v50, %v1567_v0 }
  0x9c   : > { %471 = vrot.lane.b32.xlu0 %v467_v5, %s1428_s23 }
  0x9f   : > { %486 = vrot.lane.b32.xlu1 %v481_v7, %s1428_s23  ;;  %v679_v7 = vmul.f32 %v678_v3, %v1567_v0 }
  0xa0   : > { %484 = vrot.lane.b32.xlu0 %v480_v8, %s1428_s23 }
  0xa3   : > { %499 = vrot.lane.b32.xlu1 %v494_v10, %s1428_s23 }
  0xa4   : > { %497 = vrot.lane.b32.xlu0 %v493_v11, %s1428_s23  ;;  %s1190_s23 = sld [smem:[#allocation6 + $0x10a]] }
  0xa7   : > { %512 = vrot.lane.b32.xlu1 %v507_v13, %s1429_s4  ;;  %v704_v13 = vstv %s1191_s26  ;;  %s1788_s26 = sld [smem:[#allocation6 + $0x10d]] }
  0xa8   : > { %510 = vrot.lane.b32.xlu0 %v506_v14, %s1429_s4 }
  0xaa   : > { %v691_v8 = vstv %s1190_s23  ;;  %s1763_s23 = sld [smem:[#allocation6 + $0x8d]] }
  0xab   : > { %526 = vrot.lane.b32.xlu1 %v521_v16, %s1429_s4  ;;  %v693_v11 = vmul.f32 %v691_v8, %v1569_v1  ;;  %v692_v12 = vmul.f32 %v691_v8, %v1567_v0  ;;  %v706_v16 = vmul.f32 %v704_v13, %v1569_v1  ;;  %v175_v8 = vstv %s1727_s14  ;;  %s1437_s14 = smov 113  }
  0xac   : > { %524 = vrot.lane.b32.xlu0 %v520_v17, %s1429_s4  ;;  %v705_v17 = vmul.f32 %v704_v13, %v1567_v0 }
  0xaf   : > { %539 = vrot.lane.b32.xlu1 %v534_v19, %s1429_s4 }
  0xb0   : > { %537 = vrot.lane.b32.xlu0 %v533_v20, %s1429_s4 }
  0xb3   : > { %552 = vrot.lane.b32.xlu1 %v547_v22, %s1429_s4  ;;  %v718_v22 = vmul.f32 %v717_v18, %v1567_v0 }
  0xb4   : > { %550 = vrot.lane.b32.xlu0 %v546_v23, %s1429_s4  ;;  %s1194_s4 = sld [smem:[#allocation6 + $0x10b]]  ;;  %v731_v23 = vstv %s1193_s30 }
  0xb5   : > { %v732_v27 = vmul.f32 %v731_v23, %v1567_v0  ;;  %s1827_s30 = sld [smem:[#allocation6 + $0xe]] }
  0xb7   : > { %565 = vrot.lane.b32.xlu1 %v560_v25, %s1430_s6 }
  0xb8   : > { %563 = vrot.lane.b32.xlu0 %v559_v26, %s1430_s6  ;;  %v733_v26 = vmul.f32 %v731_v23, %v1569_v1 }
  0xb9   : > { %v1631_v31 = vpop.permute.xlu1 %206 }
  0xba   : > { %v1633_v32 = vpop.permute.xlu0 %192 }
  0xbb   : > { %579 = vrot.lane.b32.xlu1 %v574_v28, %s1430_s6  ;;  %v744_v28 = vstv %s1194_s4  ;;  %s1839_s4 = sld [smem:[#allocation6 + $0x8e]] }
  0xbc   : > { %577 = vrot.lane.b32.xlu0 %v573_v29, %s1430_s6 }
  0xbd   : > { %v1637_v36 = vpop.permute.xlu1 %208 }
  0xbe   : > { %v1639_v37 = vpop.permute.xlu0 %194 }
  0xbf   : > { %592 = vrot.lane.b32.xlu1 %v587_v33, %s1430_s6  ;;  %v746_v33 = vmul.f32 %v744_v28, %v1569_v1 }
  0xc0   : > { %590 = vrot.lane.b32.xlu0 %v586_v34, %s1430_s6  ;;  %v745_v34 = vmul.f32 %v744_v28, %v1567_v0 }
  0xc1   : > { %v1643_v41 = vpop.permute.xlu1 %221 }
  0xc2   : > { %v1645_v42 = vpop.permute.xlu0 %219 }
  0xc3   : > { %605 = vrot.lane.b32.xlu1 %v600_v38, %s1430_s6  ;;  %v223_v3 = vsel %vm196_vm0, %v1645_v42, %v1643_v41 }
  0xc4   : > { %603 = vrot.lane.b32.xlu0 %v599_v39, %s1430_s6  ;;  %s1150_s6 = sld [smem:[#allocation6 + $0x100]] }
  0xc5   : > { %v1649_v46 = vpop.permute.xlu1 %234 }
  0xc6   : > { %v1651_v47 = vpop.permute.xlu0 %232 }
  0xc7   : > { %618 = vrot.lane.b32.xlu1 %v613_v43, %s1431_s20  ;;  %v758_v43 = vmul.f32 %v757_v35, %v1567_v0 }
  0xc8   : > { %616 = vrot.lane.b32.xlu0 %v612_v44, %s1431_s20  ;;  %v770_v44 = vstv %s1196_s3  ;;  %s1436_s3 = smov 114  }
  0xc9   : > { %v1655_v51 = vpop.permute.xlu1 %247  ;;  %v771_v50 = vmul.f32 %v770_v44, %v1567_v0 }
  0xca   : > { %v1657_v52 = vpop.permute.xlu0 %245 }
  0xcb   : > { %632 = vrot.lane.b32.xlu1 %v627_v48, %s1431_s20 }
  0xcc   : > { %630 = vrot.lane.b32.xlu0 %v626_v49, %s1431_s20  ;;  %v772_v49 = vmul.f32 %v770_v44, %v1569_v1 }
  0xcd   : > { %v1661_v56 = vpop.permute.xlu1 %261 }
  0xce   : > { %v1663_v57 = vpop.permute.xlu0 %259 }
  0xcf   : > { %645 = vrot.lane.b32.xlu1 %v640_v53, %s1431_s20  ;;  %v784_v53 = vstv %s1713_s5  ;;  %s1208_s5 = sld [smem:[#allocation6 + $0xf]] }
  0xd0   : > { %643 = vrot.lane.b32.xlu0 %v639_v54, %s1431_s20  ;;  %v181_v54 = vstv %s1150_s6  ;;  %s1209_s6 = sld [smem:[#allocation6 + $0x8f]] }
  0xd1   : > { %v1667_v61 = vpop.permute.xlu1 %274  ;;  %v182_v60 = vmul.f32 %v181_v54, %v1567_v0 }
  0xd2   : > { %v1669_v62 = vpop.permute.xlu0 %272 }
  0xd3   : > { %658 = vrot.lane.b32.xlu1 %v653_v58, %s1431_s20  ;;  %v225_v41 = vadd.f32 %v223_v3, %v182_v60  ;;  %v837_v60 = vstv %s1763_s23 }
  0xd4   : > { %656 = vrot.lane.b32.xlu0 %v652_v59, %s1431_s20  ;;  %s1736_s20 = sld [smem:[#allocation6 + $0x80]]  ;;  %v786_v59 = vmul.f32 %v784_v53, %v1569_v1 }
  0xd5   : > { %v1673_v4 = vpop.permute.xlu1 %287 }
  0xd6   : > { %v1675_v5 = vpop.permute.xlu0 %285 }
  0xd7   : > { %671 = vrot.lane.b32.xlu1 %v666_v63, %s1432_s27  ;;  %v785_v63 = vmul.f32 %v784_v53, %v1567_v0  ;;  %v289_v35 = vsel %vm249_vm2, %v1675_v5, %v1673_v4  ;;  %v210_v53 = vsel %vm196_vm0, %v1631_v31, %v1637_v36  ;;  %v263_v31 = vsel %vm249_vm2, %v1663_v57, %v1661_v56 }
  0xd8   : > { %669 = vrot.lane.b32.xlu0 %v665_v2, %s1432_s27  ;;  %v797_v2 = vstv %s1723_s15  ;;  %v839_v56 = vmul.f32 %v837_v60, %v1569_v1  ;;  %v838_v57 = vmul.f32 %v837_v60, %v1567_v0  ;;  %v929_v60 = vstv %s1208_s5  ;;  %s1210_s15 = sld [smem:[#allocation6 + $0x10f]] }
  0xd9   : > { %v1679_v9 = vpop.permute.xlu1 %300  ;;  %v798_v18 = vmul.f32 %v797_v2, %v1567_v0 }
  0xda   : > { %v1681_v10 = vpop.permute.xlu0 %298 }
  0xdb   : > { %685 = vrot.lane.b32.xlu1 %v680_v6, %s1432_s27  ;;  %v184_v6 = vstv %s1725_s7  ;;  %s1211_s7 = sld [smem:[#allocation6 + $0x18f]] }
  0xdc   : > { %683 = vrot.lane.b32.xlu0 %v679_v7, %s1432_s27  ;;  %v185_v42 = vmul.f32 %v184_v6, %v1567_v0 }
  0xdd   : > { %v1685_v14 = vpop.permute.xlu1 %314 }
  0xde   : > { %v1687_v15 = vpop.permute.xlu0 %312 }
  0xdf   : > { %698 = vrot.lane.b32.xlu1 %v693_v11, %s1432_s27 }
  0xe0   : > { %696 = vrot.lane.b32.xlu0 %v692_v12, %s1432_s27  ;;  %v276_v12 = vsel %vm249_vm2, %v1669_v62, %v1667_v61  ;;  %v178_v61 = vstv %s1736_s20  ;;  %v176_v62 = vmul.f32 %v175_v8, %v1567_v0 }
  0xe1   : > { %v1691_v19 = vpop.permute.xlu1 %327 }
  0xe2   : > { %v1693_v20 = vpop.permute.xlu0 %325 }
  0xe3   : > { %711 = vrot.lane.b32.xlu1 %v706_v16, %s1432_s27  ;;  %v799_v16 = vmul.f32 %v797_v2, %v1569_v1  ;;  %v316_v2 = vsel %vm302_vm3, %v1687_v15, %v1685_v14 }
  0xe4   : > { %709 = vrot.lane.b32.xlu0 %v705_v17, %s1432_s27  ;;  %v810_v17 = vstv %s1731_s19  ;;  %s1810_s27 = sld [smem:[#allocation6 + $0x18d]]  ;;  %s1148_s19 = sshll.u32 %s1555_s29, 5 }
  0xe5   : > { %v1697_v24 = vpop.permute.xlu1 %340  ;;  %v812_v28 = vmul.f32 %v810_v17, %v1569_v1  ;;  %s171_s20 = scalar_lea.vmem [#allocation7], %s1148_s19 }
  0xe6   : > { %v1699_v25 = vpop.permute.xlu0 %338 }
  0xe7   : > { %724 = vrot.lane.b32.xlu1 %v719_v21, %s1433_s17  ;;  %v236_v21 = vsel %vm196_vm0, %v1651_v47, %v1649_v46  ;;  %v342_v4 = vsel %vm302_vm3, %v1699_v25, %v1697_v24 }
  0xe8   : > { %722 = vrot.lane.b32.xlu0 %v718_v22, %s1433_s17  ;;  %v329_v22 = vsel %vm302_vm3, %v1693_v20, %v1691_v19  ;;  %v238_v19 = vadd.f32 %v236_v21, %v185_v42 }
  0xe9   : > { %v1705_v29 = vpop.permute.xlu1 %353 }
  0xea   : > { %v1707_v30 = vpop.permute.xlu0 %351 }
  0xeb   : > { %738 = vrot.lane.b32.xlu1 %v733_v26, %s1433_s17  ;;  %v278_v26 = vadd.f32 %v276_v12, %v225_v41  ;;  %v356_v36 = vsel %vm355_vm4, %v1707_v30, %v1705_v29 }
  0xec   : > { %736 = vrot.lane.b32.xlu0 %v732_v27, %s1433_s17 }
  0xed   : > { %v1715_v38 = vpop.permute.xlu1 %367  ;;  %v331_v20 = vadd.f32 %v329_v22, %v278_v26  ;;  %v876_v26 = vstv %s1827_s30 }
  0xee   : > { %v1717_v39 = vpop.permute.xlu0 %365 }
  0xef   : > { %751 = vrot.lane.b32.xlu1 %v746_v33, %s1433_s17  ;;  %v823_v33 = vstv %s1738_s21  ;;  %v369_v14 = vsel %vm355_vm4, %v1717_v39, %v1715_v38  ;;  %s1221_s21 = sshll.u32 %s1477_s13, 9  ;;  %s1438_s13 = smov [#allocation7]  }
  0xf0   : > { %749 = vrot.lane.b32.xlu0 %v745_v34, %s1433_s17  ;;  %v197_v34 = vsel %vm196_vm0, %v1633_v32, %v1639_v37  ;;  %v179_v32 = vmul.f32 %v178_v61, %v1567_v0  ;;  %v250_v37 = vsel %vm249_vm2, %v1657_v52, %v1655_v51  ;;  %v303_v51 = vsel %vm302_vm3, %v1681_v10, %v1679_v9 }
  0xf1   : > { %v381_v45 = vpop.permute.xlu1 %380  ;;  %v199_v44 = vadd.f32 %v197_v34, %v176_v62  ;;  %v863_v61 = vstv %s1810_s27  ;;  %v878_v34 = vmul.f32 %v876_v26, %v1569_v1  ;;  %s1934_s27 = scalar_lea.hbm %s1981_s2, %s1221_s21 }
  0xf2   : > { %v379_v48 = vpop.permute.xlu0 %378  ;;  %v212_v10 = vadd.f32 %v210_v53, %v179_v32  ;;  %v865_v21 = vmul.f32 %v863_v61, %v1569_v1 }
  0xf3   : > { %764 = vrot.lane.b32.xlu1 %v759_v40, %s1433_s17  ;;  %v382_v46 = vsel %vm355_vm4, %v379_v48, %v381_v45  ;;  %v811_v40 = vmul.f32 %v810_v17, %v1567_v0  ;;  %v291_v45 = vadd.f32 %v289_v35, %v238_v19  ;;  %v252_v25 = vadd.f32 %v250_v37, %v199_v44 }
  0xf4   : > { %762 = vrot.lane.b32.xlu0 %v758_v43, %s1433_s17  ;;  %v825_v43 = vmul.f32 %v823_v33, %v1569_v1  ;;  %v384_v48 = vadd.f32 %v382_v46, %v331_v20  ;;  %v265_v29 = vadd.f32 %v263_v31, %v212_v10  ;;  %v877_v46 = vmul.f32 %v876_v26, %v1567_v0  ;;  %s1856_s17 = sld [smem:[#allocation6 + $0x18e]] }
  0xf5   : > { %v394_v55 = vpop.permute.xlu1 %393  ;;  %v344_v54 = vadd.f32 %v342_v4, %v291_v45  ;;  %v931_v10 = vmul.f32 %v929_v60, %v1569_v1 }
  0xf6   : > { %v392_v58 = vpop.permute.xlu0 %391  ;;  %v318_v8 = vadd.f32 %v316_v2, %v265_v29 }
  0xf7   : > { %777 = vrot.lane.b32.xlu1 %v772_v49, %s1434_s22  ;;  %v395_v52 = vsel %vm355_vm4, %v392_v58, %v394_v55  ;;  %v305_v55 = vadd.f32 %v303_v51, %v252_v25 }
  0xf8   : > { %775 = vrot.lane.b32.xlu0 %v771_v50, %s1434_s22  ;;  %v824_v50 = vmul.f32 %v823_v33, %v1567_v0  ;;  %v397_v58 = vadd.f32 %v395_v52, %v344_v54  ;;  %v371_v41 = vadd.f32 %v369_v14, %v318_v8 }
  0xf9   : > { %v407_v7 = vpop.permute.xlu1 %406  ;;  %v358_v30 = vadd.f32 %v356_v36, %v305_v55 }
  0xfa   : > { %v405_v11 = vpop.permute.xlu0 %404  ;;  %v916_v53 = vstv %s1856_s17 }
  0xfb   : > { %v1755_v13 = vsel %vm408_vm1, %v405_v11, %v407_v7  ;;  %791 = vrot.lane.b32.xlu1 %v786_v59, %s1434_s22  ;;  %v850_v7 = vstv %s1788_s26  ;;  %v918_v25 = vmul.f32 %v916_v53, %v1569_v1 }
  0xfc   : > { %789 = vrot.lane.b32.xlu0 %v785_v63, %s1434_s22  ;;  %v411_v11 = vadd.f32 %v1755_v13, %v358_v30  ;;  %v852_v17 = vmul.f32 %v850_v7, %v1569_v1 }
  0xfd   : > { %v421_v23 = vpop.permute.xlu1 %420 }
  0xfe   : > { %v419_v27 = vpop.permute.xlu0 %418 }
  0xff   : > { %v1783_v47 = vsel %vm408_vm1, %v419_v27, %v421_v23  ;;  %804 = vrot.lane.b32.xlu1 %v799_v16, %s1434_s22  ;;  %v864_v23 = vmul.f32 %v863_v61, %v1567_v0 }
 0x100   : > { %802 = vrot.lane.b32.xlu0 %v798_v18, %s1434_s22  ;;  %v851_v18 = vmul.f32 %v850_v7, %v1567_v0  ;;  %v424_v39 = vadd.f32 %v1783_v47, %v371_v41  ;;  %v890_v47 = vstv %s1839_s4  ;;  %s1355_s4 = sshll.u32 %s1438_s13, 4  ;;  %s1356_s4 = int_to_ptr.vmem [resolvable:$false] %s1355_s4 }
 0x101   : > { %v434_v5 = vpop.permute.xlu1 %433  ;;  %v892_v32 = vmul.f32 %v890_v47, %v1569_v1  ;;  %v891_v4 = vmul.f32 %v890_v47, %v1567_v0 }
 0x102   : > { %v432_v49 = vpop.permute.xlu0 %431 }
 0x103   : > { %v435_v24 = vsel %vm408_vm1, %v432_v49, %v434_v5  ;;  %817 = vrot.lane.b32.xlu1 %v812_v28, %s1434_s22  ;;  %v903_v5 = vstv %s1848_s8  ;;  %s1357_s8 = scalar_lea.vmem %s1356_s4, 1024 }
 0x104   : > { %v437_v59 = vadd.f32 %v435_v24, %v384_v48  ;;  %815 = vrot.lane.b32.xlu0 %v811_v40, %s1434_s22  ;;  %v905_v48 = vmul.f32 %v903_v5, %v1569_v1  ;;  %s1053_s22 = sshll.u32 %s171_s20, 4  ;;  %s1936_s22 = int_to_ptr.vmem [resolvable:$true] %s1053_s22 }
 0x105   : > { %v447_v9 = vpop.permute.xlu1 %446  ;;  %s1351_s30 = scalar_lea.vmem %s1936_s22, 512  ;;  %p1358_p11 = scmp.lt.s32.totalorder %s1936_s22, %s1356_s4 }
 0x106   : > { %v445_v63 = vpop.permute.xlu0 %444  ;;  %p1352_p8 = scmp.ne.s32.totalorder %s1936_s22, %s1351_s30  ;;  %p1359_p0 = scmp.lt.s32.totalorder %s1357_s8, %s1351_s30 }
 0x107   : > { %v448_v3 = vsel %vm408_vm1, %v445_v63, %v447_v9  ;;  %830 = vrot.lane.b32.xlu1 %v825_v43, %s1435_s28  ;;  %v943_v63 = vstv %s1209_s6 }
 0x108   : > { %v450_v6 = vadd.f32 %v448_v3, %v397_v58  ;;  %828 = vrot.lane.b32.xlu0 %v824_v50, %s1435_s28  ;;  %v904_v50 = vmul.f32 %v903_v5, %v1567_v0  ;;  %v930_v58 = vmul.f32 %v929_v60, %v1567_v0  ;;  %v944_v30 = vmul.f32 %v943_v63, %v1567_v0  ;;  %p1353_p7 = pnand %p1352_p8, %p1995_p9  ;;  %p1360_p3 = por %p1359_p0, %p1358_p11 }
 0x109   : > { %v460_v15 = vpop.permute.xlu1 %459 }
 0x10a   : > { %v458_v12 = vpop.permute.xlu0 %457  ;;  %p1354_p10 = pneg %p1353_p7 }
 0x10b   : > { %v462_v16 = vsel %vm461_vm5, %v458_v12, %v460_v15  ;;  %844 = vrot.lane.b32.xlu1 %v839_v56, %s1435_s28 }
 0x10c   : > { %v464_v42 = vadd.f32 %v462_v16, %v411_v11  ;;  %842 = vrot.lane.b32.xlu0 %v838_v57, %s1435_s28  ;;  %v945_v57 = vmul.f32 %v943_v63, %v1569_v1  ;;  %v969_v16 = vstv %s1211_s7  ;;  %p1361_p5 = pnand %p1360_p3, %p1354_p10 }
 0x10d   : > { %v474_v38 = vpop.permute.xlu1 %473 }
 0x10e   : > { %v472_v13 = vpop.permute.xlu0 %471 }
 0x10f   : > { %v475_v62 = vsel %vm461_vm5, %v472_v13, %v474_v38  ;;  %857 = vrot.lane.b32.xlu1 %v852_v17, %s1435_s28  ;;  %v970_v38 = vmul.f32 %v969_v16, %v1567_v0 }
 0x110   : > { %v477_v22 = vadd.f32 %v475_v62, %v424_v39  ;;  %855 = vrot.lane.b32.xlu0 %v851_v18, %s1435_s28  ;;  %v971_v18 = vmul.f32 %v969_v16, %v1569_v1 }
 0x111   : > { %v487_v27 = vpop.permute.xlu1 %486 }
 0x112   : > { %v485_v28 = vpop.permute.xlu0 %484 }
 0x113   : > { %v488_v33 = vsel %vm461_vm5, %v485_v28, %v487_v27  ;;  %870 = vrot.lane.b32.xlu1 %v865_v21, %s1435_s28 }
 0x114   : > { %v490_v35 = vadd.f32 %v488_v33, %v437_v59  ;;  %868 = vrot.lane.b32.xlu0 %v864_v23, %s1435_s28  ;;  %v917_v59 = vmul.f32 %v916_v53, %v1567_v0  ;;  %s1040_s28 = scalar_lea.sflag [#allocation4], %s1555_s29 }
 0x115   : > { %v500_v19 = vpop.permute.xlu1 %499 }
 0x116   : > { %v498_v20 = vpop.permute.xlu0 %497 }
 0x117   : > { %v501_v40 = vsel %vm461_vm5, %v498_v20, %v500_v19  ;;  %883 = vrot.lane.b32.xlu1 %v878_v34, %s1436_s3 }
 0x118   : > { %v503_v37 = vadd.f32 %v501_v40, %v450_v6  ;;  %881 = vrot.lane.b32.xlu0 %v877_v46, %s1436_s3  ;;  %v956_v6 = vstv %s1210_s15 }
 0x119   : > { %v513_v43 = vpop.permute.xlu1 %512  ;;  %v958_v8 = vmul.f32 %v956_v6, %v1569_v1  ;;  %v957_v12 = vmul.f32 %v956_v6, %v1567_v0 }
 0x11a   : > { %v511_v44 = vpop.permute.xlu0 %510 }
 0x11b   : > { %v515_v45 = vsel %vm514_vm6, %v511_v44, %v513_v43  ;;  %897 = vrot.lane.b32.xlu1 %v892_v32, %s1436_s3 }
 0x11c   : > { %v517_v49 = vadd.f32 %v515_v45, %v464_v42  ;;  %895 = vrot.lane.b32.xlu0 %v891_v4, %s1436_s3 }
 0x11d   : > { %v527_v51 = vpop.permute.xlu1 %526 }
 0x11e   : > { %v525_v52 = vpop.permute.xlu0 %524 }
 0x11f   : > { %v528_v24 = vsel %vm514_vm6, %v525_v52, %v527_v51  ;;  %910 = vrot.lane.b32.xlu1 %v905_v48, %s1436_s3 }
 0x120   : > { %v530_v54 = vadd.f32 %v528_v24, %v477_v22  ;;  %908 = vrot.lane.b32.xlu0 %v904_v50, %s1436_s3 }
 0x121   : > { %v540_v31 = vpop.permute.xlu1 %539 }
 0x122   : > { %v538_v36 = vpop.permute.xlu0 %537 }
 0x123   : > { %v541_v9 = vsel %vm514_vm6, %v538_v36, %v540_v31  ;;  %923 = vrot.lane.b32.xlu1 %v918_v25, %s1436_s3 }
 0x124   : > { %v543_v55 = vadd.f32 %v541_v9, %v490_v35  ;;  %921 = vrot.lane.b32.xlu0 %v917_v59, %s1436_s3 }
 0x125   : > { %v553_v2 = vpop.permute.xlu1 %552 }
 0x126   : > { %v551_v3 = vpop.permute.xlu0 %550 }
 0x127   : > { %v554_v56 = vsel %vm514_vm6, %v551_v3, %v553_v2  ;;  %936 = vrot.lane.b32.xlu1 %v931_v10, %s1437_s14 }
 0x128   : > { %v556_v29 = vadd.f32 %v554_v56, %v503_v37  ;;  %934 = vrot.lane.b32.xlu0 %v930_v58, %s1437_s14 }
 0x129   : > { %v566_v7 = vpop.permute.xlu1 %565 }
 0x12a   : > { %v564_v14 = vpop.permute.xlu0 %563 }
 0x12b   : > { %v568_v15 = vsel %vm567_vm7, %v564_v14, %v566_v7  ;;  %950 = vrot.lane.b32.xlu1 %v945_v57, %s1437_s14 }
 0x12c   : > { %v570_v11 = vadd.f32 %v568_v15, %v517_v49  ;;  %948 = vrot.lane.b32.xlu0 %v944_v30, %s1437_s14 }
 0x12d   : > { %v580_v17 = vpop.permute.xlu1 %579 }
 0x12e   : > { %v578_v41 = vpop.permute.xlu0 %577 }
 0x12f   : > { %v581_v42 = vsel %vm567_vm7, %v578_v41, %v580_v17  ;;  %963 = vrot.lane.b32.xlu1 %v958_v8, %s1437_s14 }
 0x130   : > { %v583_v61 = vadd.f32 %v581_v42, %v530_v54  ;;  %961 = vrot.lane.b32.xlu0 %v957_v12, %s1437_s14 }
 0x131   : > { %v593_v39 = vpop.permute.xlu1 %592 }
 0x132   : > { %v591_v13 = vpop.permute.xlu0 %590 }
 0x133   : > { %v594_v62 = vsel %vm567_vm7, %v591_v13, %v593_v39  ;;  %976 = vrot.lane.b32.xlu1 %v971_v18, %s1437_s14 }
 0x134   : > { %v596_v21 = vadd.f32 %v594_v62, %v543_v55  ;;  %974 = vrot.lane.b32.xlu0 %v970_v38, %s1437_s14 }
 0x135   : > { %v606_v22 = vpop.permute.xlu1 %605 }
 0x136   : > { %v604_v23 = vpop.permute.xlu0 %603 }
 0x137   : > { %v607_v26 = vsel %vm567_vm7, %v604_v23, %v606_v22 }
 0x138   : > { %v609_v27 = vadd.f32 %v607_v26, %v556_v29 }
 0x139   : > { %v619_v28 = vpop.permute.xlu1 %618 }
 0x13a   : > { %v617_v33 = vpop.permute.xlu0 %616 }
 0x13b   : > { %v621_v1 = vsel %vm620_vm8, %v617_v33, %v619_v28  ;;  %v981_v28 = vlaneseq }
 0x13c   : > { %v623_v34 = vadd.f32 %v621_v1, %v570_v11 }
 0x13d   : > { %v633_v35 = vpop.permute.xlu1 %632 }
 0x13e   : > { %v631_v46 = vpop.permute.xlu0 %630 }
 0x13f   : > { %v634_v0 = vsel %vm620_vm8, %v631_v46, %v633_v35 }
 0x140   : > { %v636_v47 = vadd.f32 %v634_v0, %v583_v61 }
 0x141   : > { %v646_v19 = vpop.permute.xlu1 %645 }
 0x142   : > { %v644_v20 = vpop.permute.xlu0 %643 }
 0x143   : > { %v647_v40 = vsel %vm620_vm8, %v644_v20, %v646_v19  ;;  %v982_v20 = vand.u32 127, %v981_v28 }
 0x144   : > { %v649_v32 = vadd.f32 %v647_v40, %v596_v21 }
 0x145   : > { %v659_v37 = vpop.permute.xlu1 %658  ;;  %vm983_vm15 = vcmp.lt.s32.totalorder %v982_v20, 49 }
 0x146   : > { %v657_v4 = vpop.permute.xlu0 %656 }
 0x147   : > { %v660_v5 = vsel %vm620_vm8, %v657_v4, %v659_v37 }
 0x148   : > { %v662_v43 = vadd.f32 %v660_v5, %v609_v27 }
 0x149   : > { %v672_v44 = vpop.permute.xlu1 %671 }
 0x14a   : > { %v670_v45 = vpop.permute.xlu0 %669 }
 0x14b   : > { %v674_v48 = vsel %vm673_vm9, %v670_v45, %v672_v44 }
 0x14c   : > { %v676_v49 = vadd.f32 %v674_v48, %v623_v34 }
 0x14d   : > { %v686_v50 = vpop.permute.xlu1 %685 }
 0x14e   : > { %v684_v53 = vpop.permute.xlu0 %683 }
 0x14f   : > { %v687_v51 = vsel %vm673_vm9, %v684_v53, %v686_v50 }
 0x150   : > { %v689_v52 = vadd.f32 %v687_v51, %v636_v47 }
 0x151   : > { %v699_v24 = vpop.permute.xlu1 %698 }
 0x152   : > { %v697_v25 = vpop.permute.xlu0 %696 }
 0x153   : > { %v700_v54 = vsel %vm673_vm9, %v697_v25, %v699_v24 }
 0x154   : > { %v1891_v59 = vadd.f32 %v700_v54, %v649_v32 }
 0x155   : > { %v712_v60 = vpop.permute.xlu1 %711 }
 0x156   : > { %v710_v31 = vpop.permute.xlu0 %709 }
 0x157   : > { %v713_v36 = vsel %vm673_vm9, %v710_v31, %v712_v60 }
 0x158   : > { %v1893_v9 = vadd.f32 %v713_v36, %v662_v43 }
 0x159   : > { %v725_v10 = vpop.permute.xlu1 %724 }
 0x15a   : > { %v723_v55 = vpop.permute.xlu0 %722 }
 0x15b   : > { %v727_v22 = vsel %vm726_vm10, %v723_v55, %v725_v10 }
 0x15c   : > { %v729_v33 = vadd.f32 %v727_v22, %v676_v49 }
 0x15d   : > { %v739_v58 = vpop.permute.xlu1 %738 }
 0x15e   : > { %v737_v63 = vpop.permute.xlu0 %736 }
 0x15f   : > { %v740_v1 = vsel %vm726_vm10, %v737_v63, %v739_v58 }
 0x160   : > { %v742_v40 = vadd.f32 %v740_v1, %v689_v52 }
 0x161   : > { %v752_v2 = vpop.permute.xlu1 %751 }
 0x162   : > { %v750_v3 = vpop.permute.xlu0 %749 }
 0x163   : > { %v753_v37 = vsel %vm726_vm10, %v750_v3, %v752_v2 }
 0x164   : > { %v755_v53 = vadd.f32 %v753_v37, %v1891_v59 }
 0x165   : > { %v765_v56 = vpop.permute.xlu1 %764 }
 0x166   : > { %v763_v57 = vpop.permute.xlu0 %762 }
 0x167   : > { %v766_v24 = vsel %vm726_vm10, %v763_v57, %v765_v56 }
 0x168   : > { %v768_v63 = vadd.f32 %v766_v24, %v1893_v9 }
 0x169   : > { %v778_v29 = vpop.permute.xlu1 %777 }
 0x16a   : > { %v776_v30 = vpop.permute.xlu0 %775 }
 0x16b   : > { %v780_v27 = vsel %vm779_vm11, %v776_v30, %v778_v29 }
 0x16c   : > { %v782_v46 = vadd.f32 %v780_v27, %v729_v33 }
 0x16d   : > { %v792_v6 = vpop.permute.xlu1 %791 }
 0x16e   : > { %v790_v7 = vpop.permute.xlu0 %789 }
 0x16f   : > { %v793_v47 = vsel %vm779_vm11, %v790_v7, %v792_v6 }
 0x170   : > { %v795_v43 = vadd.f32 %v793_v47, %v742_v40 }
 0x171   : > { %v805_v14 = vpop.permute.xlu1 %804 }
 0x172   : > { %v803_v15 = vpop.permute.xlu0 %802 }
 0x173   : > { %v806_v48 = vsel %vm779_vm11, %v803_v15, %v805_v14 }
 0x174   : > { %v808_v60 = vadd.f32 %v806_v48, %v755_v53 }
 0x175   : > { %v818_v8 = vpop.permute.xlu1 %817 }
 0x176   : > { %v816_v11 = vpop.permute.xlu0 %815 }
 0x177   : > { %v819_v55 = vsel %vm779_vm11, %v816_v11, %v818_v8 }
 0x178   : > { %v821_v29 = vadd.f32 %v819_v55, %v768_v63 }
 0x179   : > { %v831_v12 = vpop.permute.xlu1 %830 }
 0x17a   : > { %v829_v16 = vpop.permute.xlu0 %828 }
 0x17b   : > { %v833_v34 = vsel %vm832_vm12, %v829_v16, %v831_v12 }
 0x17c   : > { %v835_v32 = vadd.f32 %v833_v34, %v782_v46 }
 0x17d   : > { %v845_v17 = vpop.permute.xlu1 %844 }
 0x17e   : > { %v843_v41 = vpop.permute.xlu0 %842 }
 0x17f   : > { %v846_v4 = vsel %vm832_vm12, %v843_v41, %v845_v17 }
 0x180   : > { %v848_v51 = vadd.f32 %v846_v4, %v795_v43 }
 0x181   : > { %v858_v42 = vpop.permute.xlu1 %857 }
 0x182   : > { %v856_v18 = vpop.permute.xlu0 %855 }
 0x183   : > { %v859_v25 = vsel %vm832_vm12, %v856_v18, %v858_v42 }
 0x184   : > { %v861_v2 = vadd.f32 %v859_v25, %v808_v60 }
 0x185   : > { %v871_v61 = vpop.permute.xlu1 %870 }
 0x186   : > { %v869_v38 = vpop.permute.xlu0 %868 }
 0x187   : > { %v872_v56 = vsel %vm832_vm12, %v869_v38, %v871_v61 }
 0x188   : > { %v874_v8 = vadd.f32 %v872_v56, %v821_v29 }
 0x189   : > { %v884_v39 = vpop.permute.xlu1 %883 }
 0x18a   : > { %v882_v13 = vpop.permute.xlu0 %881 }
 0x18b   : > { %v886_v19 = vsel %vm885_vm13, %v882_v13, %v884_v39 }
 0x18c   : > { %v888_v44 = vadd.f32 %v886_v19, %v835_v32 }
 0x18d   : > { %v898_v62 = vpop.permute.xlu1 %897 }
 0x18e   : > { %v896_v21 = vpop.permute.xlu0 %895 }
 0x18f   : > { %v899_v49 = vsel %vm885_vm13, %v896_v21, %v898_v62 }
 0x190   : > { %v901_v31 = vadd.f32 %v899_v49, %v848_v51 }
 0x191   : > { %v911_v23 = vpop.permute.xlu1 %910 }
 0x192   : > { %v909_v26 = vpop.permute.xlu0 %908 }
 0x193   : > { %v912_v58 = vsel %vm885_vm13, %v909_v26, %v911_v23 }
 0x194   : > { %v914_v30 = vadd.f32 %v912_v58, %v861_v2 }
 0x195   : > { %v924_v35 = vpop.permute.xlu1 %923 }
 0x196   : > { %v922_v0 = vpop.permute.xlu0 %921 }
 0x197   : > { %v925_v14 = vsel %vm885_vm13, %v922_v0, %v924_v35 }
 0x198   : > { %v927_v12 = vadd.f32 %v925_v14, %v874_v8 }
 0x199   : > { %v937_v5 = vpop.permute.xlu1 %936 }
 0x19a   : > { %v935_v45 = vpop.permute.xlu0 %934 }
 0x19b   : > { %v939_v50 = vsel %vm938_vm14, %v935_v45, %v937_v5 }
 0x19c   : > { %v1907_v52 = vadd.f32 %v939_v50, %v888_v44 }
 0x19d   : > { %v951_v54 = vpop.permute.xlu1 %950 }
 0x19e   : > { %v949_v36 = vpop.permute.xlu0 %948  ;;  %v984_v10 = vsel %vm983_vm15, %v1907_v52, -inf }
 0x19f   : > { %v952_v59 = vsel %vm938_vm14, %v949_v36, %v951_v54  ;;  %985 = vmax.xlane.f32.xlu0 %v984_v10 }
 0x1a0   : > { %v1917_v3 = vadd.f32 %v952_v59, %v901_v31 }
 0x1a1   : > { %v964_v57 = vpop.permute.xlu1 %963 }
 0x1a2   : > { %v962_v6 = vpop.permute.xlu0 %961  ;;  %v997_v7 = vsel %vm983_vm15, %v1917_v3, -inf }
 0x1a3   : > { %v965_v15 = vsel %vm938_vm14, %v962_v6, %v964_v57  ;;  %998 = vmax.xlane.f32.xlu1 %v997_v7 }
 0x1a4   : > { %v967_v11 = vadd.f32 %v965_v15, %v914_v30 }
 0x1a5   : > { %v977_v9 = vpop.permute.xlu1 %976 }
 0x1a6   : > { %v975_v16 = vpop.permute.xlu0 %974  ;;  %v1011_v17 = vsel %vm983_vm15, %v967_v11, -inf }
 0x1a7   : > { %v978_v41 = vsel %vm938_vm14, %v975_v16, %v977_v9  ;;  %1012 = vmax.xlane.f32.xlu0 %v1011_v17 }
 0x1a8   : > { %v980_v42 = vadd.f32 %v978_v41, %v927_v12 }
 0x1aa   : > { %v1025_v18 = vsel %vm983_vm15, %v980_v42, -inf }
 0x1ab   : > { %1026 = vmax.xlane.f32.xlu0 %v1025_v18 }
 0x228   : > { %v986_v61 = vpop.xlane.xlu0 %985 }
 0x229   : > { %v987_v38 = vsub.f32 %v984_v10, %v986_v61  ;;  %v992_v32 = vsub.f32 %v1907_v52, %v986_v61 }
 0x22b   : > { %v988_v39 = vmul.f32 1.442695, %v987_v38 }
 0x22c   : > { %v999_v13 = vpop.xlane.xlu1 %998 }
 0x22d   : > { %1296 = vpow2.f32 %v988_v39  ;;  %v1000_v62 = vsub.f32 %v997_v7, %v999_v13  ;;  %v1005_v43 = vsub.f32 %v1917_v3, %v999_v13 }
 0x22f   : > { %v1001_v21 = vmul.f32 1.442695, %v1000_v62 }
 0x230   : > { %v1013_v22 = vpop.xlane.xlu0 %1012 }
 0x231   : > { %1298 = vpow2.f32 %v1001_v21  ;;  %v1014_v23 = vsub.f32 %v1011_v17, %v1013_v22  ;;  %v1019_v49 = vsub.f32 %v967_v11, %v1013_v22 }
 0x233   : > { %v1015_v26 = vmul.f32 1.442695, %v1014_v23 }
 0x234   : > { %v1027_v27 = vpop.xlane.xlu0 %1026 }
 0x235   : > { %1300 = vpow2.f32 %v1015_v26  ;;  %v1028_v28 = vsub.f32 %v1025_v18, %v1027_v27  ;;  %v1033_v52 = vsub.f32 %v980_v42, %v1027_v27 }
 0x237   : > { %v1029_v33 = vmul.f32 1.442695, %v1028_v28 }
 0x239   : > { %1302 = vpow2.f32 %v1029_v33 }
 0x23a   : > { %v1297_v1 = vpop.eup %1296 }
 0x23b   : > { %990 = vadd.xlane.f32.xlu1 %v1297_v1 }
 0x23e   : > { %v1299_v34 = vpop.eup %1298 }
 0x23f   : > { %1003 = vadd.xlane.f32.xlu0 %v1299_v34 }
 0x242   : > { %v1301_v35 = vpop.eup %1300 }
 0x243   : > { %1017 = vadd.xlane.f32.xlu1 %v1301_v35 }
 0x246   : > { %v1303_v46 = vpop.eup %1302 }
 0x247   : > { %1031 = vadd.xlane.f32.xlu0 %v1303_v46 }
 0x2c4   : > { %v991_v0 = vpop.xlane.xlu1 %990 }
 0x2c5   : > { %1304 = vlog2.f32 %v991_v0 }
 0x2c8   : > { %v1004_v47 = vpop.xlane.xlu0 %1003 }
 0x2c9   : > { %1306 = vlog2.f32 %v1004_v47 }
 0x2cc   : > { %v1018_v19 = vpop.xlane.xlu1 %1017 }
 0x2cd   : > { %1308 = vlog2.f32 %v1018_v19 }
 0x2d0   : > { %v1032_v20 = vpop.xlane.xlu0 %1031 }
 0x2d1   : > { %1310 = vlog2.f32 %v1032_v20 }
 0x2d2   : > { %v1305_v40 = vpop.eup %1304 }
 0x2d3   : > { %v994_v37 = vmul.f32 0.6931472, %v1305_v40 }
 0x2d5   : > { %v995_v4 = vsub.f32 %v992_v32, %v994_v37 }
 0x2d6   : > { %v1307_v5 = vpop.eup %1306 }
 0x2d7   : > { %996 = vst [vmem:[%s171_s20] sm:$0xff] %v995_v4  ;;  %v1007_v44 = vmul.f32 0.6931472, %v1307_v5 }
 0x2d9   : > { %v1008_v45 = vsub.f32 %v1005_v43, %v1007_v44 }
 0x2da   : > { %v1309_v48 = vpop.eup %1308 }
 0x2db   : > { %1212 = vst [vmem:[%s171_s20 + $0x8] sm:$0xff] %v1008_v45  ;;  %v1021_v50 = vmul.f32 0.6931472, %v1309_v48 }
 0x2dd   : > { %v1022_v53 = vsub.f32 %v1019_v49, %v1021_v50 }
 0x2de   : > { %v1311_v51 = vpop.eup %1310 }
 0x2df   : > { %1213 = vst [vmem:[%s171_s20 + $0x10] sm:$0xff] %v1022_v53  ;;  %v1035_v24 = vmul.f32 0.6931472, %v1311_v51 }
 0x2e1   : > { %v1036_v25 = vsub.f32 %v1033_v52, %v1035_v24 }
 0x2e3   : > { %1214 = vst [vmem:[%s171_s20 + $0x18] sm:$0xff] %v1036_v25 }
 0x2e4   : > { %1364 = shalt.err (!%p1361_p5)
}
 0x2e5   : > { %s1365_s17 = scalar_lea.hbm %s1934_s27, 512  ;;  %s1369_s6 = scalar_lea.hbm %s1981_s2, 1024 }
 0x2e6   : > { %p1366_p2 = scmp.ne.s32.totalorder %s1934_s27, %s1365_s17  ;;  %p1370_p1 = scmp.lt.s32.totalorder %s1934_s27, %s1981_s2 }
 0x2e7   : > { %p1371_p4 = scmp.lt.s32.totalorder %s1369_s6, %s1365_s17 }
 0x2e8   : > { %p1367_p12 = pnand %p1366_p2, %p1995_p9 }
 0x2e9   : > { %p1372_p6 = por %p1371_p4, %p1370_p1 }
 0x2ea   : > { %p1368_p13 = pneg %p1367_p12 }
 0x2ec   : > { %p1373_p8 = pnand %p1372_p6, %p1368_p13 }
 0x2ee   : > { %1376 = shalt.err (!%p1373_p8)
}
 0x2ef   : > { %s1439_s14 = smov 128   ;;  %s1440_s19 = smov 8  }
 0x2f0   : > { %1228 = dma.vmem_to_hbm [thread:$0]  (%p1995_p9), %s1936_s22, 512, %s1934_s27, %s1040_s28, %s1439_s14, %s1439_s14, %s1440_s19  }
 0x2f1 PF: > { %s1068_s20 = sand.u32 1, %s1407_s9   ;;  %p1996_p7 = scmp.ne.s32.totalorder %s1987_s16, 0 }
 0x2f2   : > { %p1997_p10 = scmp.ge.s32.totalorder %s1419_s12, 2  ;;  %s1069_s21 = scalar_lea.sflag [#allocation4], %s1068_s20 }
 0x2f4   : > { %p1239_p11 = pnand %p1997_p10, %p1996_p7 }
 0x2f6   : > { %p1240_p0 = pneg %p1239_p11 }
 0x2f8   : > { %1402 = dma.done.wait (%p1240_p0), %s1069_s21, 512  }
 0x2f9   : > { %1404 = vsyncadd (%p1240_p0), %s1069_s21, 4294966784  ;;  %p16_p3 = scmp.ge.s32.totalorder %s1502_s18, 4   ;;  %s1998_s9 = smov %s1411_s10 }
 0x2fa   : > { %s1999_s10 = smov %s1415_s11  ;;  %s2000_s11 = smov %s1519_s24 }
 0x2fb   : > { %s2001_s12 = smov %s1502_s18  ;;  %18 = sbr.rel (!%p16_p3) target bundleno = 6 (0x6), region = 81 }
 0x300   :  { %1074 = vsyncpa [#allocation3], 1 }
 0x301   :  { %1076 = vsyncpa [#allocation3 + $0x1], 1 }
 0x302   :  { %1077 = vsyncpa [#allocation4], 1 }
 0x303   :  { %1079 = vsyncpa [#allocation4 + $0x1], 1 }
 0x304   :  { %1080 = vsyncpa [#allocation5], 1 }
 0x305   :  { %1082 = vsyncpa [#allocation5 + $0x1], 1 }

</bundles_post_ra>
